<compile_context>
chip_gen: v5e
topology: v5e:2x2
jax: 0.10.0
libtpu: 0.0.40
codegen_flags: <defaults>
</compile_context>

<pallas_src>
import jax
import jax.numpy as jnp
from jax.experimental import pallas as pl
from jax.experimental.pallas import tpu as pltpu


def vae_kernel(
    x_ref, eps_ref,
    we_ref, wmv_ref, wd1_ref, wd2_ref,   # bf16 weights (D,H) (H,2Z) (Z,H) (H,D)
    bias_ref,                             # f32 packed biases (1, H + 2Z + H + D)
    xhat_ref, mean_ref, logvar_ref,
):
    H = we_ref.shape[1]
    Z = mean_ref.shape[1]
    D = xhat_ref.shape[1]

    # static lane offsets into the packed bias vector: [be | bmv | bd1 | bd2]
    be = bias_ref[:, 0:H]
    bmv = bias_ref[:, H:H + 2 * Z]
    bd1 = bias_ref[:, H + 2 * Z:2 * H + 2 * Z]
    bd2 = bias_ref[:, 2 * H + 2 * Z:2 * H + 2 * Z + D]

    x = x_ref[...]
    eps = eps_ref[...]

    # ---- encoder: bf16 MXU matmuls, f32 accumulation, f32 elementwise ----
    h = jnp.dot(x.astype(jnp.bfloat16), we_ref[...],
                preferred_element_type=jnp.float32) + be
    h = jnp.maximum(h, 0.0)

    # fused [mean | log_var] projection: one (H, 2Z) matmul, lane-aligned split
    mv = jnp.dot(h.astype(jnp.bfloat16), wmv_ref[...],
                 preferred_element_type=jnp.float32) + bmv
    mean = mv[:, :Z]
    log_var = mv[:, Z:]

    # ---- reparameterise in f32: z = mean + exp(0.5 * log_var) * eps ----
    z = mean + jnp.exp(0.5 * log_var) * eps

    # ---- decoder ----
    g = jnp.dot(z.astype(jnp.bfloat16), wd1_ref[...],
                preferred_element_type=jnp.float32) + bd1
    g = jnp.maximum(g, 0.0)
    logits = jnp.dot(g.astype(jnp.bfloat16), wd2_ref[...],
                     preferred_element_type=jnp.float32) + bd2

    xhat_ref[...] = jax.nn.sigmoid(logits).astype(xhat_ref.dtype)
    mean_ref[...] = mean.astype(mean_ref.dtype)
    logvar_ref[...] = log_var.astype(logvar_ref.dtype)


def vae_forward(x, eps, params, *, block_b=256):
    B, D = x.shape
    Z = eps.shape[1]
    H = params["we"].shape[1]

    # Big batch tile: collapse the grid when B <= block_b (single step, full
    # MXU M-occupancy, no per-step pipeline overhead).
    tb = min(block_b, B)
    num_blocks = pl.cdiv(B, tb)
    grid = (num_blocks,)

    # batch-tiled activations / outputs
    batched = lambda cols: pl.BlockSpec((tb, cols), lambda i: (i, 0))
    # weights & packed bias: same block every grid step -> VMEM-resident
    resident = lambda a: pl.BlockSpec(a.shape, lambda i: (0,) * a.ndim)

    weights = (params["we"], params["wmv"], params["wd1"], params["wd2"])
    bias = params["bias"]

    # advisory cost hint so XLA schedules around the custom call sensibly
    flops = 2 * B * (D * H + H * 2 * Z + Z * H + H * D)
    transcendentals = B * (Z + D)                       # exp (reparam) + sigmoid
    bytes_accessed = (
        x.size * x.dtype.itemsize
        + eps.size * eps.dtype.itemsize
        + sum(w.size * w.dtype.itemsize for w in weights)
        + bias.size * bias.dtype.itemsize
        + 4 * (B * D + 2 * B * Z)                       # f32 outputs
    )

    return pl.pallas_call(
        vae_kernel,
        out_shape=(
            jax.ShapeDtypeStruct((B, D), jnp.float32),   # x_hat
            jax.ShapeDtypeStruct((B, Z), jnp.float32),   # mean
            jax.ShapeDtypeStruct((B, Z), jnp.float32),   # log_var
        ),
        grid=grid,
        in_specs=[batched(D), batched(Z)]
        + [resident(w) for w in weights]
        + [resident(bias)],
        out_specs=(batched(D), batched(Z), batched(Z)),
        compiler_params=pltpu.CompilerParams(
            # megacore batch split only pays off with >= 2 full-size steps
            dimension_semantics=("parallel",) if num_blocks > 1 else ("arbitrary",),
        ),
        cost_estimate=pl.CostEstimate(
            flops=flops,
            transcendentals=transcendentals,
            bytes_accessed=bytes_accessed,
        ),
    )(x, eps, *weights, bias)


def init_params(key, D, H, Z):
    ks = jax.random.split(key, 10)

    def lin(k, fan_in, fan_out):
        scale = 1.0 / jnp.sqrt(fan_in)
        return jax.random.uniform(k, (fan_in, fan_out), jnp.float32, -scale, scale)

    def bias(k, fan_in, fan_out):
        scale = 1.0 / jnp.sqrt(fan_in)
        return jax.random.uniform(k, (1, fan_out), jnp.float32, -scale, scale)

    wm = lin(ks[1], H, Z)
    wv = lin(ks[2], H, Z)
    be = bias(ks[5], D, H)
    bm = bias(ks[6], H, Z)
    bv = bias(ks[7], H, Z)
    bd1 = bias(ks[8], Z, H)
    bd2 = bias(ks[9], H, D)
    return {
        # weights stored in bf16 (MXU-native, half the HBM traffic); biases f32
        "we":  lin(ks[0], D, H).astype(jnp.bfloat16),
        "wmv": jnp.concatenate([wm, wv], axis=1).astype(jnp.bfloat16),   # (H, 2Z)
        "wd1": lin(ks[3], Z, H).astype(jnp.bfloat16),
        "wd2": lin(ks[4], H, D).astype(jnp.bfloat16),
        # packed biases: [be | bm | bv | bd1 | bd2] -> (1, H + 2Z + H + D)
        "bias": jnp.concatenate([be, bm, bv, bd1, bd2], axis=1),
    }


if __name__ == "__main__":
    # batch, input dim, hidden, latent — feature dims multiples of 256 so all
    # four matmuls fill the v6e/v7x 256-wide MXU (and remain 128-native on v5e)
    B, D, H, Z = 32, 256, 256, 256

    key = jax.random.PRNGKey(0)
    k_x, k_eps, k_p = jax.random.split(key, 3)

    x = jax.random.normal(k_x, (B, D), jnp.float32)
    eps = jax.random.normal(k_eps, (B, Z), jnp.float32)   # torch.randn_like(var)
    params = init_params(k_p, D, H, Z)

    x_hat, mean, log_var = jax.block_until_ready(vae_forward(x, eps, params))

    # ---- sanity check against a pure-JAX f32 reference (bf16 weights upcast) ----
    f32 = lambda a: a.astype(jnp.float32)
    b = params["bias"]
    be, bmv = b[:, 0:H], b[:, H:H + 2 * Z]
    bd1, bd2 = b[:, H + 2 * Z:2 * H + 2 * Z], b[:, 2 * H + 2 * Z:]

    h = jnp.maximum(x @ f32(params["we"]) + be, 0.0)
    mv = h @ f32(params["wmv"]) + bmv
    m_ref, lv_ref = mv[:, :Z], mv[:, Z:]
    z_ref = m_ref + jnp.exp(0.5 * lv_ref) * eps
    g = jnp.maximum(z_ref @ f32(params["wd1"]) + bd1, 0.0)
    xh_ref = jax.nn.sigmoid(g @ f32(params["wd2"]) + bd2)

    # tolerances loosened for bf16 matmul inputs (f32 accumulation)
    assert jnp.allclose(mean, m_ref, atol=5e-2, rtol=5e-2), "mean mismatch"
    assert jnp.allclose(log_var, lv_ref, atol=5e-2, rtol=5e-2), "log_var mismatch"
    assert jnp.allclose(x_hat, xh_ref, atol=5e-2, rtol=5e-2), "x_hat mismatch"

    print("KERNEL_OK")
</pallas_src>

<mosaic_0001>
module attributes {stable_mosaic.version = 11 : i64} {
  func.func @vae_kernel(%arg0: i32, %arg1: memref<32x256xf32, #tpu.memory_space<vmem>>, %arg2: memref<32x256xf32, #tpu.memory_space<vmem>>, %arg3: memref<256x256xbf16, #tpu.memory_space<vmem>>, %arg4: memref<256x512xbf16, #tpu.memory_space<vmem>>, %arg5: memref<256x256xbf16, #tpu.memory_space<vmem>>, %arg6: memref<256x256xbf16, #tpu.memory_space<vmem>>, %arg7: memref<1x1280xf32, #tpu.memory_space<vmem>>, %arg8: memref<32x256xf32, #tpu.memory_space<vmem>>, %arg9: memref<32x256xf32, #tpu.memory_space<vmem>>, %arg10: memref<32x256xf32, #tpu.memory_space<vmem>>) attributes {dimension_semantics = [#tpu.dimension_semantics<arbitrary>], iteration_bounds = array<i64: 1>, scalar_prefetch = 0 : i64, scratch_operands = 0 : i64, tpu.core_type = #tpu.core_type<tc>, window_params = [{transform_indices = @transform_0, window_bounds = array<i64: 32, 256>}, {transform_indices = @transform_1, window_bounds = array<i64: 32, 256>}, {pipeline_mode = #tpu.pipeline_mode<synchronous>, transform_indices = @transform_2, window_bounds = array<i64: 256, 256>}, {pipeline_mode = #tpu.pipeline_mode<synchronous>, transform_indices = @transform_3, window_bounds = array<i64: 256, 512>}, {pipeline_mode = #tpu.pipeline_mode<synchronous>, transform_indices = @transform_4, window_bounds = array<i64: 256, 256>}, {pipeline_mode = #tpu.pipeline_mode<synchronous>, transform_indices = @transform_5, window_bounds = array<i64: 256, 256>}, {pipeline_mode = #tpu.pipeline_mode<synchronous>, transform_indices = @transform_6, window_bounds = array<i64: 1, 1280>}, {transform_indices = @transform_7, window_bounds = array<i64: 32, 256>}, {transform_indices = @transform_8, window_bounds = array<i64: 32, 256>}, {transform_indices = @transform_9, window_bounds = array<i64: 32, 256>}]} {
    %c0 = arith.constant 0 : index
    %c0_0 = arith.constant 0 : index
    %0 = vector.load %arg7[%c0, %c0_0] : memref<1x1280xf32, #tpu.memory_space<vmem>>, vector<1x256xf32>
    %c0_1 = arith.constant 0 : index
    %c256 = arith.constant 256 : index
    %1 = vector.load %arg7[%c0_1, %c256] : memref<1x1280xf32, #tpu.memory_space<vmem>>, vector<1x512xf32>
    %c0_2 = arith.constant 0 : index
    %c768 = arith.constant 768 : index
    %2 = vector.load %arg7[%c0_2, %c768] : memref<1x1280xf32, #tpu.memory_space<vmem>>, vector<1x256xf32>
    %c0_3 = arith.constant 0 : index
    %c1024 = arith.constant 1024 : index
    %3 = vector.load %arg7[%c0_3, %c1024] : memref<1x1280xf32, #tpu.memory_space<vmem>>, vector<1x256xf32>
    %c0_4 = arith.constant 0 : index
    %c0_5 = arith.constant 0 : index
    %4 = vector.load %arg1[%c0_4, %c0_5] : memref<32x256xf32, #tpu.memory_space<vmem>>, vector<32x256xf32>
    %c0_6 = arith.constant 0 : index
    %c0_7 = arith.constant 0 : index
    %5 = vector.load %arg2[%c0_6, %c0_7] : memref<32x256xf32, #tpu.memory_space<vmem>>, vector<32x256xf32>
    %6 = arith.truncf %4 : vector<32x256xf32> to vector<32x256xbf16>
    %c0_8 = arith.constant 0 : index
    %c0_9 = arith.constant 0 : index
    %7 = vector.load %arg3[%c0_8, %c0_9] : memref<256x256xbf16, #tpu.memory_space<vmem>>, vector<256x256xbf16>
    %cst = arith.constant dense<0.000000e+00> : vector<32x256xf32>
    %8 = tpu.matmul %6, %7, %cst {dimension_numbers = #tpu.dot_dimension_numbers<[1], [0], [0], [1], [0, 0, 1, 1], [], []>} : vector<32x256xbf16>, vector<256x256xbf16>, vector<32x256xf32> -> vector<32x256xf32>
    %9 = vector.broadcast %0 : vector<1x256xf32> to vector<32x256xf32>
    %10 = arith.addf %8, %9 : vector<32x256xf32>
    %cst_10 = arith.constant 0.000000e+00 : f32
    %11 = vector.broadcast %cst_10 : f32 to vector<32x256xf32>
    %12 = arith.maximumf %10, %11 : vector<32x256xf32>
    %13 = arith.truncf %12 : vector<32x256xf32> to vector<32x256xbf16>
    %c0_11 = arith.constant 0 : index
    %c0_12 = arith.constant 0 : index
    %14 = vector.load %arg4[%c0_11, %c0_12] : memref<256x512xbf16, #tpu.memory_space<vmem>>, vector<256x512xbf16>
    %cst_13 = arith.constant dense<0.000000e+00> : vector<32x512xf32>
    %15 = tpu.matmul %13, %14, %cst_13 {dimension_numbers = #tpu.dot_dimension_numbers<[1], [0], [0], [1], [0, 0, 1, 1], [], []>} : vector<32x256xbf16>, vector<256x512xbf16>, vector<32x512xf32> -> vector<32x512xf32>
    %16 = vector.broadcast %1 : vector<1x512xf32> to vector<32x512xf32>
    %17 = arith.addf %15, %16 : vector<32x512xf32>
    %18 = vector.extract_strided_slice %17 {offsets = [0, 0], sizes = [32, 256], strides = [1, 1]} : vector<32x512xf32> to vector<32x256xf32>
    %19 = vector.extract_strided_slice %17 {offsets = [0, 256], sizes = [32, 256], strides = [1, 1]} : vector<32x512xf32> to vector<32x256xf32>
    %cst_14 = arith.constant 5.000000e-01 : f32
    %20 = vector.broadcast %cst_14 : f32 to vector<32x256xf32>
    %21 = arith.mulf %20, %19 : vector<32x256xf32>
    %22 = math.exp %21 : vector<32x256xf32>
    %23 = arith.mulf %22, %5 : vector<32x256xf32>
    %24 = arith.addf %18, %23 : vector<32x256xf32>
    %25 = arith.truncf %24 : vector<32x256xf32> to vector<32x256xbf16>
    %c0_15 = arith.constant 0 : index
    %c0_16 = arith.constant 0 : index
    %26 = vector.load %arg5[%c0_15, %c0_16] : memref<256x256xbf16, #tpu.memory_space<vmem>>, vector<256x256xbf16>
    %cst_17 = arith.constant dense<0.000000e+00> : vector<32x256xf32>
    %27 = tpu.matmul %25, %26, %cst_17 {dimension_numbers = #tpu.dot_dimension_numbers<[1], [0], [0], [1], [0, 0, 1, 1], [], []>} : vector<32x256xbf16>, vector<256x256xbf16>, vector<32x256xf32> -> vector<32x256xf32>
    %28 = vector.broadcast %2 : vector<1x256xf32> to vector<32x256xf32>
    %29 = arith.addf %27, %28 : vector<32x256xf32>
    %cst_18 = arith.constant 0.000000e+00 : f32
    %30 = vector.broadcast %cst_18 : f32 to vector<32x256xf32>
    %31 = arith.maximumf %29, %30 : vector<32x256xf32>
    %32 = arith.truncf %31 : vector<32x256xf32> to vector<32x256xbf16>
    %c0_19 = arith.constant 0 : index
    %c0_20 = arith.constant 0 : index
    %33 = vector.load %arg6[%c0_19, %c0_20] : memref<256x256xbf16, #tpu.memory_space<vmem>>, vector<256x256xbf16>
    %cst_21 = arith.constant dense<0.000000e+00> : vector<32x256xf32>
    %34 = tpu.matmul %32, %33, %cst_21 {dimension_numbers = #tpu.dot_dimension_numbers<[1], [0], [0], [1], [0, 0, 1, 1], [], []>} : vector<32x256xbf16>, vector<256x256xbf16>, vector<32x256xf32> -> vector<32x256xf32>
    %35 = vector.broadcast %3 : vector<1x256xf32> to vector<32x256xf32>
    %36 = arith.addf %34, %35 : vector<32x256xf32>
    %37 = arith.negf %36 : vector<32x256xf32>
    %38 = math.exp %37 : vector<32x256xf32>
    %cst_22 = arith.constant 1.000000e+00 : f32
    %39 = vector.broadcast %cst_22 : f32 to vector<32x256xf32>
    %40 = arith.addf %39, %38 : vector<32x256xf32>
    %41 = arith.divf %39, %40 : vector<32x256xf32>
    %c0_23 = arith.constant 0 : index
    %c0_24 = arith.constant 0 : index
    %42 = vector.load %arg8[%c0_23, %c0_24] : memref<32x256xf32, #tpu.memory_space<vmem>>, vector<32x256xf32>
    tpu.vector_store %arg8[%c0_23, %c0_24], %41 {strides = array<i32>} : memref<32x256xf32, #tpu.memory_space<vmem>>, vector<32x256xf32>,
    %c0_25 = arith.constant 0 : index
    %c0_26 = arith.constant 0 : index
    %43 = vector.load %arg9[%c0_25, %c0_26] : memref<32x256xf32, #tpu.memory_space<vmem>>, vector<32x256xf32>
    tpu.vector_store %arg9[%c0_25, %c0_26], %18 {strides = array<i32>} : memref<32x256xf32, #tpu.memory_space<vmem>>, vector<32x256xf32>,
    %c0_27 = arith.constant 0 : index
    %c0_28 = arith.constant 0 : index
    %44 = vector.load %arg10[%c0_27, %c0_28] : memref<32x256xf32, #tpu.memory_space<vmem>>, vector<32x256xf32>
    tpu.vector_store %arg10[%c0_27, %c0_28], %19 {strides = array<i32>} : memref<32x256xf32, #tpu.memory_space<vmem>>, vector<32x256xf32>,
    return
  }
  func.func @transform_0(%arg0: i32) -> (i32, i32) {
    %c0_i32 = arith.constant 0 : i32
    %c0_i32_0 = arith.constant 0 : i32
    return %arg0, %c0_i32 : i32, i32
  }
  func.func @transform_1(%arg0: i32) -> (i32, i32) {
    %c0_i32 = arith.constant 0 : i32
    %c0_i32_0 = arith.constant 0 : i32
    return %arg0, %c0_i32 : i32, i32
  }
  func.func @transform_2(%arg0: i32) -> (i32, i32) {
    %c0_i32 = arith.constant 0 : i32
    %c0_i32_0 = arith.constant 0 : i32
    %c0_i32_1 = arith.constant 0 : i32
    return %c0_i32, %c0_i32_0 : i32, i32
  }
  func.func @transform_3(%arg0: i32) -> (i32, i32) {
    %c0_i32 = arith.constant 0 : i32
    %c0_i32_0 = arith.constant 0 : i32
    %c0_i32_1 = arith.constant 0 : i32
    return %c0_i32, %c0_i32_0 : i32, i32
  }
  func.func @transform_4(%arg0: i32) -> (i32, i32) {
    %c0_i32 = arith.constant 0 : i32
    %c0_i32_0 = arith.constant 0 : i32
    %c0_i32_1 = arith.constant 0 : i32
    return %c0_i32, %c0_i32_0 : i32, i32
  }
  func.func @transform_5(%arg0: i32) -> (i32, i32) {
    %c0_i32 = arith.constant 0 : i32
    %c0_i32_0 = arith.constant 0 : i32
    %c0_i32_1 = arith.constant 0 : i32
    return %c0_i32, %c0_i32_0 : i32, i32
  }
  func.func @transform_6(%arg0: i32) -> (i32, i32) {
    %c0_i32 = arith.constant 0 : i32
    %c0_i32_0 = arith.constant 0 : i32
    %c0_i32_1 = arith.constant 0 : i32
    return %c0_i32, %c0_i32_0 : i32, i32
  }
  func.func @transform_7(%arg0: i32) -> (i32, i32) {
    %c0_i32 = arith.constant 0 : i32
    %c0_i32_0 = arith.constant 0 : i32
    return %arg0, %c0_i32 : i32, i32
  }
  func.func @transform_8(%arg0: i32) -> (i32, i32) {
    %c0_i32 = arith.constant 0 : i32
    %c0_i32_0 = arith.constant 0 : i32
    return %arg0, %c0_i32 : i32, i32
  }
  func.func @transform_9(%arg0: i32) -> (i32, i32) {
    %c0_i32 = arith.constant 0 : i32
    %c0_i32_0 = arith.constant 0 : i32
    return %arg0, %c0_i32 : i32, i32
  }
}

</mosaic_0001>

<bundles_post_ra>
// kernel: tpu_custom_call.1
= control target key start
LH: loop header
LB: loop body
LE: loop exit
PB: predicated region body
PF: predicated region fallthrough
CT: control target
= control target key end

     0   :  { %15 = vsyncpa [#allocation3], 0  ;;  %s3169_s0 = inlined_call_operand.hbm [shape: f32[32,256], index: 0, kind: input, shape index: {}]   ;;  %s3170_s1 = inlined_call_operand.hbm [shape: f32[32,256], index: 1, kind: input, shape index: {}]   ;;  %s3171_s2 = inlined_call_operand.hbm [shape: bf16[256,256], index: 2, kind: input, shape index: {}]   ;;  %s3172_s3 = inlined_call_operand.hbm [shape: bf16[256,512], index: 3, kind: input, shape index: {}]   ;;  %s3173_s4 = inlined_call_operand.hbm [shape: bf16[256,256], index: 4, kind: input, shape index: {}]   ;;  %s3174_s5 = inlined_call_operand.hbm [shape: bf16[256,256], index: 5, kind: input, shape index: {}]   ;;  %s3175_s6 = inlined_call_operand.hbm [shape: f32[1,1280], index: 6, kind: input, shape index: {}]   ;;  %s3176_s7 = inlined_call_operand.hbm [shape: f32[32,256], index: 7, kind: output, shape index: {0}]   ;;  %s3177_s8 = inlined_call_operand.hbm [shape: f32[32,256], index: 8, kind: output, shape index: {1}]   ;;  %s3178_s9 = inlined_call_operand.hbm [shape: f32[32,256], index: 9, kind: output, shape index: {2}]  }
   0x1   :  { %16 = vsyncpa [#allocation6], 0 }
   0x2   :  { %17 = vsyncpa [#allocation9], 0 }
   0x3   :  { %18 = vsyncpa [#allocation12], 0 }
   0x4   :  { %19 = vsyncpa [#allocation4], 0 }
   0x5   :  { %20 = vsyncpa [#allocation16], 0  ;;  %s38_s11 = sshll.u32 %s3170_s1, 4  ;;  %s2949_s12 = smov [#allocation5]   ;;  %s39_s11 = int_to_ptr.hbm [resolvable:$true] %s38_s11 }
   0x6   :  { %s40_s13 = sshll.u32 %s2949_s12, 4  ;;  %s64_s16 = sshll.u32 %s3172_s3, 4  ;;  %s41_s13 = int_to_ptr.vmem [resolvable:$true] %s40_s13  ;;  %s65_s16 = int_to_ptr.hbm [resolvable:$true] %s64_s16 }
   0x7   :  { %s2950_s17 = smov 256   ;;  %s2951_s18 = smov 16  }
   0x8   :  { %46 = dma.hbm_to_vmem [thread:$0]  %s39_s11, 1024, %s41_s13, [#allocation6], %s2950_s17, %s2950_s17, %s2951_s18  }
   0x9   :  { %s2952_s19 = smov [#allocation8]   ;;  %s90_s22 = sshll.u32 %s3174_s5, 4  ;;  %s91_s22 = int_to_ptr.hbm [resolvable:$true] %s90_s22 }
   0xa   :  { %s66_s20 = sshll.u32 %s2952_s19, 4  ;;  %s2953_s3 = smov [#allocation11]   ;;  %s67_s20 = int_to_ptr.vmem [resolvable:$true] %s66_s20 }
   0xb   :  { %72 = dma.hbm_to_vmem [thread:$0]  %s65_s16, 8192, %s67_s20, [#allocation9], %s2950_s17, %s2950_s17, %s2951_s18  }
   0xc   :  { %s92_s23 = sshll.u32 %s2953_s3, 4  ;;  %s25_s26 = sshll.u32 %s3169_s0, 4  ;;  %s93_s23 = int_to_ptr.vmem [resolvable:$true] %s92_s23  ;;  %s26_s26 = int_to_ptr.hbm [resolvable:$true] %s25_s26 }
   0xd   :  { %s2954_s27 = smov 128   ;;  %s2955_s28 = smov 8  }
   0xe   :  { %98 = dma.hbm_to_vmem [thread:$0]  %s91_s22, 4096, %s93_s23, [#allocation12], %s2954_s27, %s2954_s27, %s2955_s28  }
   0xf   :  { %s2956_s29 = smov [#allocation2]   ;;  %s51_s12 = sshll.u32 %s3171_s2, 4  ;;  %s52_s12 = int_to_ptr.hbm [resolvable:$true] %s51_s12 }
  0x10   :  { %s27_s30 = sshll.u32 %s2956_s29, 4  ;;  %s77_s0 = sshll.u32 %s3173_s4, 4  ;;  %s28_s30 = int_to_ptr.vmem [resolvable:$true] %s27_s30  ;;  %s78_s0 = int_to_ptr.hbm [resolvable:$true] %s77_s0 }
  0x11   :  { %33 = dma.hbm_to_vmem [thread:$0]  %s26_s26, 1024, %s28_s30, [#allocation3], %s2950_s17, %s2950_s17, %s2951_s18  }
  0x12   :  { %s2957_s14 = smov [#allocation7]   ;;  %s2958_s16 = smov [#allocation10]  }
  0x13   :  { %s53_s15 = sshll.u32 %s2957_s14, 4  ;;  %s79_s19 = sshll.u32 %s2958_s16, 4  ;;  %s54_s15 = int_to_ptr.vmem [resolvable:$true] %s53_s15  ;;  %s80_s19 = int_to_ptr.vmem [resolvable:$true] %s79_s19 }
  0x14   :  { %59 = dma.hbm_to_vmem [thread:$0]  %s52_s12, 4096, %s54_s15, [#allocation6], %s2954_s27, %s2954_s27, %s2955_s28  }
  0x15   :  { %s104_s2 = sshll.u32 %s3175_s6, 4  ;;  %s2959_s21 = smov [#allocation13]   ;;  %s105_s2 = int_to_ptr.hbm [resolvable:$true] %s104_s2 }
  0x16   :  { %85 = dma.hbm_to_vmem [thread:$0]  %s78_s0, 4096, %s80_s19, [#allocation9], %s2954_s27, %s2954_s27, %s2955_s28  }
  0x17   :  { %s106_s22 = sshll.u32 %s2959_s21, 4  ;;  %s107_s22 = int_to_ptr.vmem [resolvable:$true] %s106_s22 }
  0x18   :  { %109 = dma.hbm_to_vmem [thread:$0]  %s105_s2, 160, %s107_s22, [#allocation12]  }
  0x19   :  { %2937 = dma.done.wait [#allocation3], 1024  }
  0x1a   :  { %2938 = vsyncadd [#allocation3], 4294966272 }
  0x1b   :  { %2939 = dma.done.wait [#allocation6], 5120  }
  0x1c   :  { %2940 = vsyncadd [#allocation6], 4294962176 }
  0x1d   :  { %2941 = dma.done.wait [#allocation9], 12288  }
  0x1e   :  { %2942 = vsyncadd [#allocation9], 4294955008 }
  0x1f   :  { %2943 = dma.done.wait [#allocation12], 4256  }
  0x20   :  { %2944 = vsyncadd [#allocation12], 4294963040  ;;  %v1885_v0 = vld [vmem:[#allocation7 + $0x70] sm:$0xf]  ;;  %v2490_v1 = vld [vmem:[#allocation7 + $0x74] sm:$0xf0] }
  0x21   :  { %v1949_v2 = vld [vmem:[#allocation7 + $0xf0] sm:$0xf]  ;;  %v1886_v3 = vor.u32 %v2490_v1, %v1885_v0  ;;  %v2506_v4 = vld [vmem:[#allocation7 + $0xf4] sm:$0xf0]  ;;  %v2489_v5 = vld [vmem:[#allocation7 + $0x74] sm:$0xf] }
  0x22   :  { %v1887_v6 = vld [vmem:[#allocation7 + $0x78] sm:$0xf0]  ;;  %v1950_v7 = vor.u32 %v2506_v4, %v1949_v2  ;;  %v2505_v9 = vld [vmem:[#allocation7 + $0xf4] sm:$0xf]  ;;  %v1877_v11 = vld [vmem:[#allocation7 + $0x60] sm:$0xf] }
  0x23   :  { %v1890_v8 = vor.u32 %v2489_v5, %v1887_v6  ;;  %v1951_v10 = vld [vmem:[#allocation7 + $0xf8] sm:$0xf0]  ;;  %359 = vmatpush.bf16.msra.mxu0 %v1886_v3  ;;  %v2488_v13 = vld [vmem:[#allocation7 + $0x64] sm:$0xf0]  ;;  %v1941_v14 = vld [vmem:[#allocation7 + $0xe0] sm:$0xf] }
  0x24   :  { %v1954_v12 = vor.u32 %v2505_v9, %v1951_v10  ;;  %v2504_v15 = vld [vmem:[#allocation7 + $0xe4] sm:$0xf0]  ;;  %378 = vmatpush.bf16.msra.mxu1 %v1950_v7  ;;  %v1878_v16 = vor.u32 %v2488_v13, %v1877_v11  ;;  %v2487_v18 = vld [vmem:[#allocation7 + $0x64] sm:$0xf]  ;;  %v1879_v19 = vld [vmem:[#allocation7 + $0x68] sm:$0xf0] }
  0x25   :  { %397 = vmatpush.bf16.msra.mxu2 %v1890_v8  ;;  %v1942_v17 = vor.u32 %v2504_v15, %v1941_v14  ;;  %v2503_v20 = vld [vmem:[#allocation7 + $0xe4] sm:$0xf]  ;;  %v1882_v21 = vor.u32 %v2487_v18, %v1879_v19  ;;  %v1943_v22 = vld [vmem:[#allocation7 + $0xe8] sm:$0xf0]  ;;  %v1869_v23 = vld [vmem:[#allocation7 + $0x50] sm:$0xf] }
  0x26   :  { %416 = vmatpush.bf16.msra.mxu3 %v1954_v12  ;;  %v2486_v24 = vld [vmem:[#allocation7 + $0x54] sm:$0xf0]  ;;  %v1946_v25 = vor.u32 %v2503_v20, %v1943_v22  ;;  %v1933_v26 = vld [vmem:[#allocation7 + $0xd0] sm:$0xf]  ;;  %v2485_v28 = vld [vmem:[#allocation7 + $0x54] sm:$0xf] }
  0x27   :  { %v2502_v27 = vld [vmem:[#allocation7 + $0xd4] sm:$0xf0]  ;;  %360 = vmatpush.bf16.msra.mxu0 %v1878_v16  ;;  %v1870_v29 = vor.u32 %v2486_v24, %v1869_v23  ;;  %v1871_v30 = vld [vmem:[#allocation7 + $0x58] sm:$0xf0]  ;;  %v2501_v31 = vld [vmem:[#allocation7 + $0xd4] sm:$0xf] }
  0x28   :  { %v1935_v32 = vld [vmem:[#allocation7 + $0xd8] sm:$0xf0]  ;;  %379 = vmatpush.bf16.msra.mxu1 %v1942_v17  ;;  %v1934_v33 = vor.u32 %v2502_v27, %v1933_v26  ;;  %v1874_v34 = vor.u32 %v2485_v28, %v1871_v30  ;;  %v1861_v35 = vld [vmem:[#allocation7 + $0x40] sm:$0xf]  ;;  %v2484_v36 = vld [vmem:[#allocation7 + $0x44] sm:$0xf0] }
  0x29   :  { %398 = vmatpush.bf16.msra.mxu2 %v1882_v21  ;;  %v1925_v37 = vld [vmem:[#allocation7 + $0xc0] sm:$0xf]  ;;  %v1938_v38 = vor.u32 %v2501_v31, %v1935_v32  ;;  %v2500_v39 = vld [vmem:[#allocation7 + $0xc4] sm:$0xf0]  ;;  %v2483_v40 = vld [vmem:[#allocation7 + $0x44] sm:$0xf]  ;;  %v1862_v44 = vor.u32 %v2484_v36, %v1861_v35 }
  0x2a   :  { %417 = vmatpush.bf16.msra.mxu3 %v1946_v25  ;;  %v1863_v41 = vld [vmem:[#allocation7 + $0x48] sm:$0xf0]  ;;  %v2499_v42 = vld [vmem:[#allocation7 + $0xc4] sm:$0xf]  ;;  %v1926_v45 = vor.u32 %v2500_v39, %v1925_v37  ;;  %v1853_v47 = vld [vmem:[#allocation7 + $0x30] sm:$0xf] }
  0x2b   :  { %v1927_v43 = vld [vmem:[#allocation7 + $0xc8] sm:$0xf0]  ;;  %361 = vmatpush.bf16.msra.mxu0 %v1870_v29  ;;  %v1866_v46 = vor.u32 %v2483_v40, %v1863_v41  ;;  %v2482_v48 = vld [vmem:[#allocation7 + $0x34] sm:$0xf0]  ;;  %v1917_v49 = vld [vmem:[#allocation7 + $0xb0] sm:$0xf] }
  0x2c   :  { %380 = vmatpush.bf16.msra.mxu1 %v1934_v33  ;;  %v1930_v50 = vor.u32 %v2499_v42, %v1927_v43  ;;  %v2498_v51 = vld [vmem:[#allocation7 + $0xb4] sm:$0xf0]  ;;  %v2481_v52 = vld [vmem:[#allocation7 + $0x34] sm:$0xf]  ;;  %v1855_v53 = vld [vmem:[#allocation7 + $0x38] sm:$0xf0]  ;;  %v1854_v56 = vor.u32 %v2482_v48, %v1853_v47 }
  0x2d   :  { %399 = vmatpush.bf16.msra.mxu2 %v1874_v34  ;;  %v2497_v54 = vld [vmem:[#allocation7 + $0xb4] sm:$0xf]  ;;  %v1919_v55 = vld [vmem:[#allocation7 + $0xb8] sm:$0xf0]  ;;  %v1918_v57 = vor.u32 %v2498_v51, %v1917_v49  ;;  %v1858_v58 = vor.u32 %v2481_v52, %v1855_v53  ;;  %v1845_v59 = vld [vmem:[#allocation7 + $0x20] sm:$0xf] }
  0x2e   :  { %418 = vmatpush.bf16.msra.mxu3 %v1938_v38  ;;  %v2480_v60 = vld [vmem:[#allocation7 + $0x24] sm:$0xf0]  ;;  %v1909_v61 = vld [vmem:[#allocation7 + $0xa0] sm:$0xf]  ;;  %v1922_v62 = vor.u32 %v2497_v54, %v1919_v55  ;;  %v2479_v0 = vld [vmem:[#allocation7 + $0x24] sm:$0xf] }
  0x2f   :  { %362 = vmatpush.bf16.msra.mxu0 %v1862_v44  ;;  %v2496_v63 = vld [vmem:[#allocation7 + $0xa4] sm:$0xf0]  ;;  %v1847_v1 = vld [vmem:[#allocation7 + $0x28] sm:$0xf0]  ;;  %v2495_v2 = vld [vmem:[#allocation7 + $0xa4] sm:$0xf]  ;;  %v1846_v4 = vor.u32 %v2480_v60, %v1845_v59 }
  0x30   :  { %381 = vmatpush.bf16.msra.mxu1 %v1926_v45  ;;  %v1911_v3 = vld [vmem:[#allocation7 + $0xa8] sm:$0xf0]  ;;  %v1910_v5 = vor.u32 %v2496_v63, %v1909_v61  ;;  %v1850_v6 = vor.u32 %v2479_v0, %v1847_v1  ;;  %v1837_v7 = vld [vmem:[#allocation7 + $0x10] sm:$0xf]  ;;  %v2478_v8 = vld [vmem:[#allocation7 + $0x14] sm:$0xf0] }
  0x31   :  { %400 = vmatpush.bf16.msra.mxu2 %v1866_v46  ;;  %v1901_v9 = vld [vmem:[#allocation7 + $0x90] sm:$0xf]  ;;  %v1914_v10 = vor.u32 %v2495_v2, %v1911_v3  ;;  %v2494_v11 = vld [vmem:[#allocation7 + $0x94] sm:$0xf0]  ;;  %v2477_v12 = vld [vmem:[#allocation7 + $0x14] sm:$0xf]  ;;  %v1838_v16 = vor.u32 %v2478_v8, %v1837_v7 }
  0x32   :  { %419 = vmatpush.bf16.msra.mxu3 %v1930_v50  ;;  %v1839_v13 = vld [vmem:[#allocation7 + $0x18] sm:$0xf0]  ;;  %v2493_v14 = vld [vmem:[#allocation7 + $0x94] sm:$0xf]  ;;  %v1829_v17 = vld [vmem:[#allocation7] sm:$0xf]  ;;  %v1902_v19 = vor.u32 %v2494_v11, %v1901_v9 }
  0x33   :  { %363 = vmatpush.bf16.msra.mxu0 %v1854_v56  ;;  %v1903_v15 = vld [vmem:[#allocation7 + $0x98] sm:$0xf0]  ;;  %v2476_v18 = vld [vmem:[#allocation7 + $0x4] sm:$0xf0]  ;;  %v1842_v20 = vor.u32 %v2477_v12, %v1839_v13  ;;  %v1893_v21 = vld [vmem:[#allocation7 + $0x80] sm:$0xf] }
  0x34   :  { %382 = vmatpush.bf16.msra.mxu1 %v1918_v57  ;;  %v2492_v22 = vld [vmem:[#allocation7 + $0x84] sm:$0xf0]  ;;  %v2475_v23 = vld [vmem:[#allocation7 + $0x4] sm:$0xf]  ;;  %v1906_v24 = vor.u32 %v2493_v14, %v1903_v15  ;;  %v1831_v25 = vld [vmem:[#allocation7 + $0x8] sm:$0xf0]  ;;  %v1830_v31 = vor.u32 %v2476_v18, %v1829_v17 }
  0x35   :  { %401 = vmatpush.bf16.msra.mxu2 %v1858_v58  ;;  %v2491_v26 = vld [vmem:[#allocation7 + $0x84] sm:$0xf]  ;;  %v1895_v27 = vld [vmem:[#allocation7 + $0x88] sm:$0xf0]  ;;  %v2069_v29 = vld [vmem:[#allocation8 + $0xe0] sm:$0xf]  ;;  %v1894_v35 = vor.u32 %v2492_v22, %v1893_v21  ;;  %v1834_v36 = vor.u32 %v2475_v23, %v1831_v25 }
  0x36   :  { %420 = vmatpush.bf16.msra.mxu3 %v1922_v62  ;;  %v142_v28 = vld [vmem:[#allocation2] sm:$0xff]  ;;  %v2537_v30 = vld [vmem:[#allocation8 + $0xec] sm:$0xf0]  ;;  %v2071_v34 = vld [vmem:[#allocation8 + $0xf0] sm:$0xf0]  ;;  %v1898_v39 = vor.u32 %v2491_v26, %v1895_v27  ;;  %s1789_s3 = sshll.u32 %s3177_s8, 4  ;;  %s1790_s3 = int_to_ptr.hbm [resolvable:$true] %s1789_s3 }
  0x37   :  { %364 = vmatpush.bf16.msra.mxu0 %v1846_v4  ;;  %v144_v32 = vld [vmem:[#allocation2 + $0x10] sm:$0xff]  ;;  %v2535_v33 = vld [vmem:[#allocation8 + $0xe4] sm:$0xf]  ;;  %v143_v37 = vld [vmem:[#allocation2 + $0x8] sm:$0xff]  ;;  %v2070_v40 = vor.u32 %v2537_v30, %v2069_v29  ;;  %s2960_s23 = smov [#allocation15]   ;;  %s1802_s27 = sshll.u32 %s3178_s9, 4  ;;  %s1803_s27 = int_to_ptr.hbm [resolvable:$true] %s1802_s27 }
  0x38   :  { %383 = vmatpush.bf16.msra.mxu1 %v1910_v5  ;;  %v145_v38 = vld [vmem:[#allocation2 + $0x18] sm:$0xff]  ;;  %v2053_v41 = vld [vmem:[#allocation8 + $0xc0] sm:$0xf]  ;;  %v2569_v43 = vld [vmem:[#allocation8 + $0x1ec] sm:$0xf0]  ;;  %v158_v44 = vpack.c.bf16 %v144_v32, %v142_v28  ;;  %v2074_v45 = vor.u32 %v2535_v33, %v2071_v34  ;;  %s1787_s24 = sshll.u32 %s2960_s23, 4  ;;  %s1788_s24 = int_to_ptr.vmem [resolvable:$true] %s1787_s24 }
  0x39   :  { %402 = vmatpush.bf16.msra.mxu2 %v1850_v6  ;;  %v2197_v42 = vld [vmem:[#allocation8 + $0x1e0] sm:$0xf]  ;;  %v2533_v46 = vld [vmem:[#allocation8 + $0xcc] sm:$0xf0]  ;;  %v2567_v47 = vld [vmem:[#allocation8 + $0x1e4] sm:$0xf]  ;;  %v159_v49 = vpack.c.bf16 %v145_v38, %v143_v37 }
  0x3a   :  { %421 = vmatpush.bf16.msra.mxu3 %v1914_v10  ;;  %v2199_v48 = vld [vmem:[#allocation8 + $0x1f0] sm:$0xf0]  ;;  %v2531_v50 = vld [vmem:[#allocation8 + $0xc4] sm:$0xf]  ;;  %v2198_v52 = vor.u32 %v2569_v43, %v2197_v42  ;;  %v2054_v53 = vor.u32 %v2533_v46, %v2053_v41  ;;  %v2037_v55 = vld [vmem:[#allocation8 + $0xa0] sm:$0xf] }
  0x3b   :  { %365 = vmatpush.bf16.msra.mxu0 %v1838_v16  ;;  %v2055_v51 = vld [vmem:[#allocation8 + $0xd0] sm:$0xf0]  ;;  %v2202_v54 = vor.u32 %v2567_v47, %v2199_v48  ;;  %v2181_v56 = vld [vmem:[#allocation8 + $0x1c0] sm:$0xf]  ;;  %v2565_v57 = vld [vmem:[#allocation8 + $0x1cc] sm:$0xf0] }
  0x3c   :  { %384 = vmatpush.bf16.msra.mxu1 %v1902_v19  ;;  %v2058_v58 = vor.u32 %v2531_v50, %v2055_v51  ;;  %v2529_v59 = vld [vmem:[#allocation8 + $0xac] sm:$0xf0]  ;;  %v2563_v60 = vld [vmem:[#allocation8 + $0x1c4] sm:$0xf]  ;;  %v2183_v61 = vld [vmem:[#allocation8 + $0x1d0] sm:$0xf0]  ;;  %v2182_v0 = vor.u32 %v2565_v57, %v2181_v56 }
  0x3d   :  { %403 = vmatpush.bf16.msra.mxu2 %v1842_v20  ;;  %v2527_v62 = vld [vmem:[#allocation8 + $0xa4] sm:$0xf]  ;;  %v2039_v63 = vld [vmem:[#allocation8 + $0xb0] sm:$0xf0]  ;;  %v2038_v1 = vor.u32 %v2529_v59, %v2037_v55  ;;  %v2186_v2 = vor.u32 %v2563_v60, %v2183_v61  ;;  %v2021_v3 = vld [vmem:[#allocation8 + $0x80] sm:$0xf] }
  0x3e   :  { %422 = vmatpush.bf16.msra.mxu3 %v1906_v24  ;;  %v2042_v4 = vor.u32 %v2527_v62, %v2039_v63  ;;  %v2525_v5 = vld [vmem:[#allocation8 + $0x8c] sm:$0xf0]  ;;  %v2559_v6 = vld [vmem:[#allocation8 + $0x1a4] sm:$0xf]  ;;  %v2167_v7 = vld [vmem:[#allocation8 + $0x1b0] sm:$0xf0] }
  0x3f   :  { %366 = vmatpush.bf16.msra.mxu0 %v1830_v31  ;;  %v2523_v8 = vld [vmem:[#allocation8 + $0x84] sm:$0xf]  ;;  %v2023_v9 = vld [vmem:[#allocation8 + $0x90] sm:$0xf0]  ;;  %v2022_v10 = vor.u32 %v2525_v5, %v2021_v3  ;;  %v2170_v11 = vor.u32 %v2559_v6, %v2167_v7  ;;  %v147_v15 = vld [vmem:[#allocation2 + $0x28] sm:$0xff]  ;;  %s2961_s28 = smov [#allocation17]  }
  0x40   :  { %385 = vmatpush.bf16.msra.mxu1 %v1894_v35  ;;  %v2026_v12 = vor.u32 %v2523_v8, %v2023_v9  ;;  %v146_v13 = vld [vmem:[#allocation2 + $0x20] sm:$0xff]  ;;  %v148_v14 = vld [vmem:[#allocation2 + $0x30] sm:$0xff]  ;;  %v149_v16 = vld [vmem:[#allocation2 + $0x38] sm:$0xff]  ;;  %s1800_s29 = sshll.u32 %s2961_s28, 4  ;;  %s2962_s8 = smov [#allocation14]   ;;  %s1801_s29 = int_to_ptr.vmem [resolvable:$true] %s1800_s29 }
  0x41   :  { %404 = vmatpush.bf16.msra.mxu2 %v1834_v36  ;;  %v160_v17 = vpack.c.bf16 %v148_v14, %v146_v13  ;;  %v161_v18 = vpack.c.bf16 %v149_v16, %v147_v15  ;;  %v2165_v19 = vld [vmem:[#allocation8 + $0x1a0] sm:$0xf]  ;;  %v2561_v20 = vld [vmem:[#allocation8 + $0x1ac] sm:$0xf0]  ;;  %v2519_v24 = vld [vmem:[#allocation8 + $0x64] sm:$0xf] }
  0x42   :  { %423 = vmatpush.bf16.msra.mxu3 %v1898_v39  ;;  %367 = vmatmul.bf16.vlgmr.msra.gmra.mxu0 %v158_v44  ;;  %v2166_v21 = vor.u32 %v2561_v20, %v2165_v19  ;;  %v2005_v22 = vld [vmem:[#allocation8 + $0x60] sm:$0xf]  ;;  %v2521_v23 = vld [vmem:[#allocation8 + $0x6c] sm:$0xf0]  ;;  %v2007_v26 = vld [vmem:[#allocation8 + $0x70] sm:$0xf0] }
  0x43   :  { %840 = vmatpush.bf16.msrb.mxu0 %v2070_v40  ;;  %386 = vmatmul.bf16.vlgmr.msra.gmra.mxu1 %v159_v49  ;;  %v2006_v25 = vor.u32 %v2521_v23, %v2005_v22  ;;  %v2010_v27 = vor.u32 %v2519_v24, %v2007_v26  ;;  %v2555_v28 = vld [vmem:[#allocation8 + $0x184] sm:$0xf]  ;;  %v2151_v29 = vld [vmem:[#allocation8 + $0x190] sm:$0xf0]  ;;  %v2149_v30 = vld [vmem:[#allocation8 + $0x180] sm:$0xf] }
  0x44   :  { %405 = vmatmul.bf16.vlgmr.msra.gmra.mxu2 %v158_v44  ;;  %859 = vmatpush.bf16.msrb.mxu1 %v2198_v52  ;;  %v2154_v31 = vor.u32 %v2555_v28, %v2151_v29  ;;  %v2557_v32 = vld [vmem:[#allocation8 + $0x18c] sm:$0xf0]  ;;  %v1989_v34 = vld [vmem:[#allocation8 + $0x40] sm:$0xf]  ;;  %v2515_v37 = vld [vmem:[#allocation8 + $0x44] sm:$0xf] }
  0x45   :  { %878 = vmatpush.bf16.msrb.mxu2 %v2074_v45  ;;  %424 = vmatmul.bf16.vlgmr.msra.gmra.mxu3 %v159_v49  ;;  %v2150_v33 = vor.u32 %v2557_v32, %v2149_v30  ;;  %v2517_v35 = vld [vmem:[#allocation8 + $0x4c] sm:$0xf0]  ;;  %v1991_v38 = vld [vmem:[#allocation8 + $0x50] sm:$0xf0]  ;;  %v2551_v40 = vld [vmem:[#allocation8 + $0x164] sm:$0xf] }
  0x46   :  { %897 = vmatpush.bf16.msrb.mxu3 %v2202_v54  ;;  %v1990_v36 = vor.u32 %v2517_v35, %v1989_v34  ;;  %v1994_v39 = vor.u32 %v2515_v37, %v1991_v38  ;;  %v2135_v41 = vld [vmem:[#allocation8 + $0x170] sm:$0xf0]  ;;  %v2133_v42 = vld [vmem:[#allocation8 + $0x160] sm:$0xf]  ;;  %v2553_v44 = vld [vmem:[#allocation8 + $0x16c] sm:$0xf0] }
  0x47   :  { %841 = vmatpush.bf16.msrb.mxu0 %v2054_v53  ;;  %v2138_v43 = vor.u32 %v2551_v40, %v2135_v41  ;;  %v2134_v45 = vor.u32 %v2553_v44, %v2133_v42  ;;  %v1973_v46 = vld [vmem:[#allocation8 + $0x20] sm:$0xf]  ;;  %v2513_v47 = vld [vmem:[#allocation8 + $0x2c] sm:$0xf0]  ;;  %v2511_v48 = vld [vmem:[#allocation8 + $0x24] sm:$0xf] }
  0x48   :  { %860 = vmatpush.bf16.msrb.mxu1 %v2182_v0  ;;  %v1974_v49 = vor.u32 %v2513_v47, %v1973_v46  ;;  %v1975_v50 = vld [vmem:[#allocation8 + $0x30] sm:$0xf0]  ;;  %v2547_v52 = vld [vmem:[#allocation8 + $0x144] sm:$0xf]  ;;  %v2117_v54 = vld [vmem:[#allocation8 + $0x140] sm:$0xf] }
  0x49   :  { %879 = vmatpush.bf16.msrb.mxu2 %v2058_v58  ;;  %v1978_v51 = vor.u32 %v2511_v48, %v1975_v50  ;;  %v2119_v53 = vld [vmem:[#allocation8 + $0x150] sm:$0xf0]  ;;  %v2549_v56 = vld [vmem:[#allocation8 + $0x14c] sm:$0xf0]  ;;  %v1957_v58 = vld [vmem:[#allocation8] sm:$0xf] }
  0x4a   :  { %898 = vmatpush.bf16.msrb.mxu3 %v2186_v2  ;;  %v2122_v55 = vor.u32 %v2547_v52, %v2119_v53  ;;  %v2118_v57 = vor.u32 %v2549_v56, %v2117_v54  ;;  %v2509_v59 = vld [vmem:[#allocation8 + $0xc] sm:$0xf0]  ;;  %v2507_v60 = vld [vmem:[#allocation8 + $0x4] sm:$0xf]  ;;  %v1959_v62 = vld [vmem:[#allocation8 + $0x10] sm:$0xf0] }
  0x4b   :  { %842 = vmatpush.bf16.msrb.mxu0 %v2038_v1  ;;  %v1958_v61 = vor.u32 %v2509_v59, %v1957_v58  ;;  %v1962_v63 = vor.u32 %v2507_v60, %v1959_v62  ;;  %v2543_v0 = vld [vmem:[#allocation8 + $0x124] sm:$0xf]  ;;  %v2103_v1 = vld [vmem:[#allocation8 + $0x130] sm:$0xf0]  ;;  %v2101_v2 = vld [vmem:[#allocation8 + $0x120] sm:$0xf] }
  0x4c   :  { %861 = vmatpush.bf16.msrb.mxu1 %v2166_v21  ;;  %v2106_v3 = vor.u32 %v2543_v0, %v2103_v1  ;;  %v2077_v6 = vld [vmem:[#allocation8 + $0xe8] sm:$0xf]  ;;  %v2538_v7 = vld [vmem:[#allocation8 + $0xf4] sm:$0xf0]  ;;  %v2536_v8 = vld [vmem:[#allocation8 + $0xec] sm:$0xf] }
  0x4d   :  { %880 = vmatpush.bf16.msrb.mxu2 %v2042_v4  ;;  %v2545_v4 = vld [vmem:[#allocation8 + $0x12c] sm:$0xf0]  ;;  %v2078_v9 = vor.u32 %v2538_v7, %v2077_v6  ;;  %v2087_v13 = vld [vmem:[#allocation8 + $0x110] sm:$0xf0]  ;;  %v2085_v14 = vld [vmem:[#allocation8 + $0x100] sm:$0xf] }
  0x4e   :  { %899 = vmatpush.bf16.msrb.mxu3 %v2170_v11  ;;  %v2102_v5 = vor.u32 %v2545_v4, %v2101_v2  ;;  %v2541_v16 = vld [vmem:[#allocation8 + $0x10c] sm:$0xf0]  ;;  %v2534_v19 = vld [vmem:[#allocation8 + $0xd4] sm:$0xf0]  ;;  %v2532_v20 = vld [vmem:[#allocation8 + $0xcc] sm:$0xf] }
  0x4f   :  { %843 = vmatpush.bf16.msrb.mxu0 %v2022_v10  ;;  %v2079_v10 = vld [vmem:[#allocation8 + $0xf8] sm:$0xf0]  ;;  %v2568_v24 = vld [vmem:[#allocation8 + $0x1ec] sm:$0xf]  ;;  %v2205_v26 = vld [vmem:[#allocation8 + $0x1e8] sm:$0xf] }
  0x50   :  { %862 = vmatpush.bf16.msrb.mxu1 %v2150_v33  ;;  %v2082_v11 = vor.u32 %v2536_v8, %v2079_v10  ;;  %v2063_v22 = vld [vmem:[#allocation8 + $0xd8] sm:$0xf0]  ;;  %v2570_v28 = vld [vmem:[#allocation8 + $0x1f4] sm:$0xf0]  ;;  %v2045_v30 = vld [vmem:[#allocation8 + $0xa8] sm:$0xf] }
  0x51   :  { %881 = vmatpush.bf16.msrb.mxu2 %v2026_v12  ;;  %v2539_v12 = vld [vmem:[#allocation8 + $0x104] sm:$0xf]  ;;  %v2066_v23 = vor.u32 %v2532_v20, %v2063_v22  ;;  %v2206_v29 = vor.u32 %v2570_v28, %v2205_v26  ;;  %v2528_v32 = vld [vmem:[#allocation8 + $0xac] sm:$0xf]  ;;  %v2047_v34 = vld [vmem:[#allocation8 + $0xb8] sm:$0xf0] }
  0x52   :  { %372 = vmatmul.bf16.gmra.mxu0 %v160_v17  ;;  %900 = vmatpush.bf16.msrb.mxu3 %v2154_v31  ;;  %v2090_v15 = vor.u32 %v2539_v12, %v2087_v13  ;;  %v2530_v31 = vld [vmem:[#allocation8 + $0xb4] sm:$0xf0]  ;;  %v2050_v35 = vor.u32 %v2528_v32, %v2047_v34  ;;  %v2191_v37 = vld [vmem:[#allocation8 + $0x1d8] sm:$0xf0]  ;;  %v2189_v38 = vld [vmem:[#allocation8 + $0x1c8] sm:$0xf] }
  0x53   :  { %391 = vmatmul.bf16.gmra.mxu1 %v161_v18  ;;  %844 = vmatpush.bf16.msrb.mxu0 %v2006_v25  ;;  %v2207_v25 = vld [vmem:[#allocation8 + $0x1f8] sm:$0xf0]  ;;  %v2046_v33 = vor.u32 %v2530_v31, %v2045_v30  ;;  %v2566_v41 = vld [vmem:[#allocation8 + $0x1d4] sm:$0xf0]  ;;  %v2013_v58 = vld [vmem:[#allocation8 + $0x68] sm:$0xf] }
  0x54   :  { %410 = vmatmul.bf16.gmra.mxu2 %v160_v17  ;;  %863 = vmatpush.bf16.msrb.mxu1 %v2134_v45  ;;  %v2086_v17 = vor.u32 %v2541_v16, %v2085_v14  ;;  %v2190_v42 = vor.u32 %v2566_v41, %v2189_v38  ;;  %v2526_v44 = vld [vmem:[#allocation8 + $0x94] sm:$0xf0]  ;;  %v2524_v45 = vld [vmem:[#allocation8 + $0x8c] sm:$0xf]  ;;  %v2031_v47 = vld [vmem:[#allocation8 + $0x98] sm:$0xf0] }
  0x55   :  { %429 = vmatmul.bf16.gmra.mxu3 %v161_v18  ;;  %882 = vmatpush.bf16.msrb.mxu2 %v2010_v27  ;;  %v2061_v18 = vld [vmem:[#allocation8 + $0xc8] sm:$0xf]  ;;  %v2210_v27 = vor.u32 %v2568_v24, %v2207_v25  ;;  %v2034_v48 = vor.u32 %v2524_v45, %v2031_v47  ;;  %v2175_v50 = vld [vmem:[#allocation8 + $0x1b8] sm:$0xf0]  ;;  %v2522_v59 = vld [vmem:[#allocation8 + $0x74] sm:$0xf0] }
  0x56   :  { %901 = vmatpush.bf16.msrb.mxu3 %v2138_v43  ;;  %v2062_v21 = vor.u32 %v2534_v19, %v2061_v18  ;;  %v2029_v43 = vld [vmem:[#allocation8 + $0x88] sm:$0xf]  ;;  %v2520_v60 = vld [vmem:[#allocation8 + $0x6c] sm:$0xf]  ;;  %v2015_v62 = vld [vmem:[#allocation8 + $0x78] sm:$0xf0] }
  0x57   :  { %845 = vmatpush.bf16.msrb.mxu0 %v1990_v36  ;;  %v2564_v36 = vld [vmem:[#allocation8 + $0x1cc] sm:$0xf]  ;;  %v2030_v46 = vor.u32 %v2526_v44, %v2029_v43  ;;  %v2159_v1 = vld [vmem:[#allocation8 + $0x198] sm:$0xf0]  ;;  %v2157_v2 = vld [vmem:[#allocation8 + $0x188] sm:$0xf] }
  0x58   :  { %864 = vmatpush.bf16.msrb.mxu1 %v2118_v57  ;;  %v2194_v40 = vor.u32 %v2564_v36, %v2191_v37  ;;  %v2556_v0 = vld [vmem:[#allocation8 + $0x18c] sm:$0xf]  ;;  %v2558_v4 = vld [vmem:[#allocation8 + $0x194] sm:$0xf0]  ;;  %v1997_v7 = vld [vmem:[#allocation8 + $0x48] sm:$0xf] }
  0x59   :  { %883 = vmatpush.bf16.msrb.mxu2 %v1994_v39  ;;  %v138_v39 = vld [vmem:[#allocation13] sm:$0x3]  ;;  %v2158_v6 = vor.u32 %v2558_v4, %v2157_v2  ;;  %v2518_v8 = vld [vmem:[#allocation8 + $0x54] sm:$0xf0]  ;;  %v1999_v12 = vld [vmem:[#allocation8 + $0x58] sm:$0xf0] }
  0x5a   :  { %902 = vmatpush.bf16.msrb.mxu3 %v2122_v55  ;;  %v3043_v52 = vperm.slane %v138_v39, 0  ;;  %v2562_v55 = vld [vmem:[#allocation8 + $0x1b4] sm:$0xf0]  ;;  %v1998_v10 = vor.u32 %v2518_v8, %v1997_v7  ;;  %v2143_v16 = vld [vmem:[#allocation8 + $0x178] sm:$0xf0]  ;;  %s1774_s9 = sshll.u32 %s2962_s8, 4  ;;  %s1775_s9 = int_to_ptr.vmem [resolvable:$true] %s1774_s9 }
  0x5b   :  { %846 = vmatpush.bf16.msrb.mxu0 %v1974_v49  ;;  %v2560_v49 = vld [vmem:[#allocation8 + $0x1ac] sm:$0xf]  ;;  %v1981_v22 = vld [vmem:[#allocation8 + $0x28] sm:$0xf]  ;;  %v1983_v30 = vld [vmem:[#allocation8 + $0x38] sm:$0xf0] }
  0x5c   :  { %865 = vmatpush.bf16.msrb.mxu1 %v2102_v5  ;;  %v2178_v54 = vor.u32 %v2560_v49, %v2175_v50  ;;  %v2548_v31 = vld [vmem:[#allocation8 + $0x14c] sm:$0xf]  ;;  %v2125_v34 = vld [vmem:[#allocation8 + $0x148] sm:$0xf]  ;;  %v1967_v44 = vld [vmem:[#allocation8 + $0x18] sm:$0xf0] }
  0x5d   :  { %884 = vmatpush.bf16.msrb.mxu2 %v1978_v51  ;;  %v2173_v51 = vld [vmem:[#allocation8 + $0x1a8] sm:$0xf]  ;;  %v2508_v41 = vld [vmem:[#allocation8 + $0xc] sm:$0xf]  ;;  %s1776_s11 = sshll.u32 %s3176_s7, 4  ;;  %s1777_s11 = int_to_ptr.hbm [resolvable:$true] %s1776_s11 }
  0x5e   :  { %903 = vmatpush.bf16.msrb.mxu3 %v2106_v3  ;;  %v2174_v57 = vor.u32 %v2562_v55, %v2173_v51  ;;  %v2162_v3 = vor.u32 %v2556_v0, %v2159_v1  ;;  %v2544_v45 = vld [vmem:[#allocation8 + $0x12c] sm:$0xf]  ;;  %v2109_v49 = vld [vmem:[#allocation8 + $0x128] sm:$0xf]  ;;  %v1970_v50 = vor.u32 %v2508_v41, %v1967_v44 }
  0x5f   :  { %847 = vmatpush.bf16.msrb.mxu0 %v1958_v61  ;;  %v2014_v61 = vor.u32 %v2522_v59, %v2013_v58  ;;  %v2093_v0 = vld [vmem:[#allocation8 + $0x108] sm:$0xf] }
  0x60   :  { %866 = vmatpush.bf16.msrb.mxu1 %v2086_v17  ;;  %v2141_v17 = vld [vmem:[#allocation8 + $0x168] sm:$0xf] }
  0x61   :  { %885 = vmatpush.bf16.msrb.mxu2 %v1962_v63  ;;  %v2018_v63 = vor.u32 %v2520_v60, %v2015_v62  ;;  %v2540_v62 = vld [vmem:[#allocation8 + $0x10c] sm:$0xf] }
  0x62   :  { %904 = vmatpush.bf16.msrb.mxu3 %v2090_v15  ;;  %v2552_v15 = vld [vmem:[#allocation8 + $0x16c] sm:$0xf] }
  0x63   :  { %916 = vmatpush.bf16.msra.mxu0 %v2078_v9  ;;  %v3046_v9 = vperm.slane %v138_v39, 1  ;;  %v2146_v20 = vor.u32 %v2552_v15, %v2143_v16  ;;  %v1965_v39 = vld [vmem:[#allocation8 + $0x8] sm:$0xf] }
  0x64   :  { %935 = vmatpush.bf16.msra.mxu1 %v2206_v29  ;;  %v2512_v29 = vld [vmem:[#allocation8 + $0x2c] sm:$0xf] }
  0x65   :  { %954 = vmatpush.bf16.msra.mxu2 %v2082_v11  ;;  %v2516_v11 = vld [vmem:[#allocation8 + $0x4c] sm:$0xf]  ;;  %v1986_v32 = vor.u32 %v2512_v29, %v1983_v30  ;;  %v2269_v30 = vld [vmem:[#allocation10 + $0x70] sm:$0xf] }
  0x66   :  { %973 = vmatpush.bf16.msra.mxu3 %v2210_v27  ;;  %v2002_v14 = vor.u32 %v2516_v11, %v1999_v12 }
  0x67   :  { %917 = vmatpush.bf16.msra.mxu0 %v2062_v21  ;;  %v2554_v21 = vld [vmem:[#allocation8 + $0x174] sm:$0xf0] }
  0x68   :  { %936 = vmatpush.bf16.msra.mxu1 %v2190_v42  ;;  %v2142_v27 = vor.u32 %v2554_v21, %v2141_v17 }
  0x69   :  { %955 = vmatpush.bf16.msra.mxu2 %v2066_v23  ;;  %v2514_v23 = vld [vmem:[#allocation8 + $0x34] sm:$0xf0] }
  0x6a   :  { %974 = vmatpush.bf16.msra.mxu3 %v2194_v40  ;;  %v1982_v28 = vor.u32 %v2514_v23, %v1981_v22  ;;  %v2510_v40 = vld [vmem:[#allocation8 + $0x14] sm:$0xf0] }
  0x6b   :  { %918 = vmatpush.bf16.msra.mxu0 %v2046_v33  ;;  %v2127_v33 = vld [vmem:[#allocation8 + $0x158] sm:$0xf0]  ;;  %v1966_v43 = vor.u32 %v2510_v40, %v1965_v39  ;;  %v2584_v39 = vld [vmem:[#allocation10 + $0x64] sm:$0xf0]  ;;  %v2583_v40 = vld [vmem:[#allocation10 + $0x64] sm:$0xf] }
  0x6c   :  { %937 = vmatpush.bf16.msra.mxu1 %v2174_v57  ;;  %v2130_v37 = vor.u32 %v2548_v31, %v2127_v33  ;;  %v2586_v31 = vld [vmem:[#allocation10 + $0x74] sm:$0xf0] }
  0x6d   :  { %956 = vmatpush.bf16.msra.mxu2 %v2050_v35  ;;  %v2550_v35 = vld [vmem:[#allocation8 + $0x154] sm:$0xf0]  ;;  %v2270_v33 = vor.u32 %v2586_v31, %v2269_v30  ;;  %v2595_v31 = vld [vmem:[#allocation10 + $0xc4] sm:$0xf] }
  0x6e   :  { %975 = vmatpush.bf16.msra.mxu3 %v2178_v54  ;;  %v2126_v38 = vor.u32 %v2550_v35, %v2125_v34  ;;  %v2271_v34 = vld [vmem:[#allocation10 + $0x78] sm:$0xf0] }
  0x6f   :  { %919 = vmatpush.bf16.msra.mxu0 %v2030_v46 }
  0x70   :  { %938 = vmatpush.bf16.msra.mxu1 %v2158_v6 }
  0x71   :  { %957 = vmatpush.bf16.msra.mxu2 %v2034_v48  ;;  %v2111_v48 = vld [vmem:[#allocation8 + $0x138] sm:$0xf0] }
  0x72   :  { %976 = vmatpush.bf16.msra.mxu3 %v2162_v3  ;;  %v2114_v51 = vor.u32 %v2544_v45, %v2111_v48  ;;  %v2542_v3 = vld [vmem:[#allocation8 + $0x114] sm:$0xf0]  ;;  %v2601_v48 = vld [vmem:[#allocation10 + $0xf4] sm:$0xf] }
  0x73   :  { %920 = vmatpush.bf16.msra.mxu0 %v2014_v61  ;;  %v2094_v4 = vor.u32 %v2542_v3, %v2093_v0  ;;  %v2325_v0 = vld [vmem:[#allocation10 + $0xe0] sm:$0xf]  ;;  %v2600_v3 = vld [vmem:[#allocation10 + $0xe4] sm:$0xf0] }
  0x74   :  { %939 = vmatpush.bf16.msra.mxu1 %v2142_v27 }
  0x75   :  { %958 = vmatpush.bf16.msra.mxu2 %v2018_v63  ;;  %v2095_v63 = vld [vmem:[#allocation8 + $0x118] sm:$0xf0] }
  0x76   :  { %977 = vmatpush.bf16.msra.mxu3 %v2146_v20  ;;  %v2098_v2 = vor.u32 %v2540_v62, %v2095_v63  ;;  %v2599_v62 = vld [vmem:[#allocation10 + $0xe4] sm:$0xf]  ;;  %v2327_v63 = vld [vmem:[#allocation10 + $0xe8] sm:$0xf0] }
  0x77   :  { %921 = vmatpush.bf16.msra.mxu0 %v1998_v10 }
  0x78   :  { %940 = vmatpush.bf16.msra.mxu1 %v2126_v38  ;;  %v2261_v38 = vld [vmem:[#allocation10 + $0x60] sm:$0xf] }
  0x79   :  { %959 = vmatpush.bf16.msra.mxu2 %v2002_v14 }
  0x7a   :  { %978 = vmatpush.bf16.msra.mxu3 %v2130_v37 }
  0x7b   :  { %922 = vmatpush.bf16.msra.mxu0 %v1982_v28 }
  0x7d   :  { %960 = vmatpush.bf16.msra.mxu2 %v1986_v32  ;;  %v2585_v32 = vld [vmem:[#allocation10 + $0x74] sm:$0xf] }
  0x7e   :  { %979 = vmatpush.bf16.msra.mxu3 %v2114_v51  ;;  %v2274_v35 = vor.u32 %v2585_v32, %v2271_v34  ;;  %v2333_v51 = vld [vmem:[#allocation10 + $0xf0] sm:$0xf]  ;;  %v2311_v32 = vld [vmem:[#allocation10 + $0xc8] sm:$0xf0] }
  0x7f   :  { %923 = vmatpush.bf16.msra.mxu0 %v1966_v43  ;;  %v2263_v43 = vld [vmem:[#allocation10 + $0x68] sm:$0xf0] }
  0x81   :  { %961 = vmatpush.bf16.msra.mxu2 %v1970_v50 }
  0x82   :  { %980 = vmatpush.bf16.msra.mxu3 %v2098_v2  ;;  %v2330_v2 = vor.u32 %v2599_v62, %v2327_v63  ;;  %v2573_v62 = vld [vmem:[#allocation10 + $0x14] sm:$0xf]  ;;  %v2223_v63 = vld [vmem:[#allocation10 + $0x18] sm:$0xf0] }
  0xbf   :  { %v368_v53 = vpop.f32.mrf.mxu0 }
  0xc0   :  { %v387_v56 = vpop.f32.mrf.mxu1  ;;  %v369_v5 = vadd.f32 %v368_v53, %v3043_v52  ;;  %v2546_v53 = vld [vmem:[#allocation8 + $0x134] sm:$0xf0] }
  0xc2   :  { %v388_v24 = vadd.f32 %v387_v56, %v369_v5  ;;  %v2110_v56 = vor.u32 %v2546_v53, %v2109_v49  ;;  %v2335_v49 = vld [vmem:[#allocation10 + $0xf8] sm:$0xf0]  ;;  %v2602_v53 = vld [vmem:[#allocation10 + $0xf4] sm:$0xf0] }
  0xc3   :  { %v2338_v50 = vor.u32 %v2601_v48, %v2335_v49  ;;  %v2231_v48 = vld [vmem:[#allocation10 + $0x28] sm:$0xf0] }
  0xc4   :  { %v435_v46 = vmax.f32 %v388_v24, 0.0  ;;  %941 = vmatpush.bf16.msra.mxu1 %v2110_v56  ;;  %v2582_v56 = vld [vmem:[#allocation10 + $0x54] sm:$0xf0] }
  0xc7   :  { %v406_v13 = vpop.f32.mrf.mxu2  ;;  %v370_v19 = vpop.f32.mrf.mxu0 }
  0xc8   :  { %v425_v18 = vpop.f32.mrf.mxu3  ;;  %v371_v25 = vadd.f32 %v370_v19, %v3043_v52  ;;  %v389_v26 = vpop.f32.mrf.mxu1  ;;  %v407_v42 = vadd.f32 %v406_v13, %v3046_v9  ;;  %942 = vmatpush.bf16.msra.mxu1 %v2094_v4 }
  0xca   :  { %v390_v36 = vadd.f32 %v389_v26, %v371_v25  ;;  %v426_v57 = vadd.f32 %v425_v18, %v407_v42  ;;  %v2262_v42 = vor.u32 %v2584_v39, %v2261_v38 }
  0xcc   :  { %v437_v47 = vmax.f32 %v390_v36, 0.0  ;;  %v436_v5 = vmax.f32 %v426_v57, 0.0 }
  0xce   :  { %v443_v54 = vpack.c.bf16 %v437_v47, %v435_v46  ;;  %v2266_v47 = vor.u32 %v2583_v40, %v2263_v43  ;;  %v2575_v43 = vld [vmem:[#allocation10 + $0x24] sm:$0xf] }
  0xcf   :  { %v408_v55 = vpop.f32.mrf.mxu2  ;;  %v373_v60 = vpop.f32.mrf.mxu0 }
  0xd0   :  { %v409_v58 = vadd.f32 %v408_v55, %v3046_v9  ;;  %v427_v59 = vpop.f32.mrf.mxu3  ;;  %v392_v61 = vpop.f32.mrf.mxu1  ;;  %848 = vmatmul.bf16.vlgmr.msrb.gmra.mxu0 %v443_v54  ;;  %886 = vmatmul.bf16.vlgmr.msrb.gmra.mxu2 %v443_v54  ;;  %v374_v7 = vadd.f32 %v373_v60, %v3043_v52  ;;  %v2253_v55 = vld [vmem:[#allocation10 + $0x50] sm:$0xf] }
  0xd1   :  { %1233 = vmatpush.bf16.msrb.mxu0 %v2270_v33  ;;  %1271 = vmatpush.bf16.msrb.mxu2 %v2274_v35  ;;  %v2254_v57 = vor.u32 %v2582_v56, %v2253_v55  ;;  %v2309_v33 = vld [vmem:[#allocation10 + $0xc0] sm:$0xf]  ;;  %v2314_v35 = vor.u32 %v2595_v31, %v2311_v32  ;;  %v2301_v56 = vld [vmem:[#allocation10 + $0xb0] sm:$0xf]  ;;  %v2587_v31 = vld [vmem:[#allocation10 + $0x84] sm:$0xf] }
  0xd2   :  { %v428_v1 = vadd.f32 %v427_v59, %v409_v58  ;;  %v393_v13 = vadd.f32 %v392_v61, %v374_v7  ;;  %v2581_v58 = vld [vmem:[#allocation10 + $0x54] sm:$0xf]  ;;  %v2255_v59 = vld [vmem:[#allocation10 + $0x58] sm:$0xf0]  ;;  %v2326_v7 = vor.u32 %v2600_v3, %v2325_v0  ;;  %v2295_v3 = vld [vmem:[#allocation10 + $0xa8] sm:$0xf0] }
  0xd3   :  { %v2258_v61 = vor.u32 %v2581_v58, %v2255_v59  ;;  %v2221_v59 = vld [vmem:[#allocation10 + $0x10] sm:$0xf]  ;;  %v2279_v32 = vld [vmem:[#allocation10 + $0x88] sm:$0xf0] }
  0xd4   :  { %v438_v6 = vmax.f32 %v428_v1, 0.0  ;;  %v439_v18 = vmax.f32 %v393_v13, 0.0 }
  0xd5   :  { %1234 = vmatpush.bf16.msrb.mxu0 %v2262_v42  ;;  %1272 = vmatpush.bf16.msrb.mxu2 %v2266_v47  ;;  %v2576_v42 = vld [vmem:[#allocation10 + $0x24] sm:$0xf0] }
  0xd6   :  { %v444_v8 = vpack.c.bf16 %v438_v6, %v436_v5 }
  0xd7   :  { %v411_v10 = vpop.f32.mrf.mxu2  ;;  %v375_v12 = vpop.f32.mrf.mxu0 }
  0xd8   :  { %v430_v11 = vpop.f32.mrf.mxu3  ;;  %867 = vmatmul.bf16.vlgmr.msrb.gmra.mxu1 %v444_v8  ;;  %905 = vmatmul.bf16.vlgmr.msrb.gmra.mxu3 %v444_v8  ;;  %v376_v14 = vadd.f32 %v375_v12, %v3043_v52  ;;  %v394_v15 = vpop.f32.mrf.mxu1  ;;  %v412_v17 = vadd.f32 %v411_v10, %v3046_v9  ;;  %v3055_v52 = vld [vmem:[#allocation13 + $0x2] sm:$0xf]  ;;  %v2580_v10 = vld [vmem:[#allocation10 + $0x44] sm:$0xf0] }
  0xd9   :  { %v3058_v29 = vperm.slane %v3055_v52, 0  ;;  %v3064_v45 = vperm.slane %v3055_v52, 1  ;;  %1290 = vmatpush.bf16.msrb.mxu3 %v2338_v50  ;;  %1235 = vmatpush.bf16.msrb.mxu0 %v2254_v57  ;;  %v2594_v57 = vld [vmem:[#allocation10 + $0xb4] sm:$0xf0] }
  0xda   :  { %v395_v16 = vadd.f32 %v394_v15, %v376_v14  ;;  %v431_v22 = vadd.f32 %v430_v11, %v412_v17  ;;  %1273 = vmatpush.bf16.msrb.mxu2 %v2258_v61  ;;  %v2579_v11 = vld [vmem:[#allocation10 + $0x44] sm:$0xf]  ;;  %v2247_v14 = vld [vmem:[#allocation10 + $0x48] sm:$0xf0]  ;;  %v2302_v58 = vor.u32 %v2594_v57, %v2301_v56 }
  0xdb   :  { %v2250_v17 = vor.u32 %v2579_v11, %v2247_v14  ;;  %v2213_v14 = vld [vmem:[#allocation10] sm:$0xf] }
  0xdc   :  { %v441_v19 = vmax.f32 %v395_v16, 0.0  ;;  %v440_v26 = vmax.f32 %v431_v22, 0.0  ;;  %v2598_v22 = vld [vmem:[#allocation10 + $0xd4] sm:$0xf0] }
  0xdd   :  { %1291 = vmatpush.bf16.msrb.mxu3 %v2330_v2  ;;  %v2591_v2 = vld [vmem:[#allocation10 + $0xa4] sm:$0xf] }
  0xde   :  { %v445_v20 = vpack.c.bf16 %v441_v19, %v439_v18  ;;  %v2597_v18 = vld [vmem:[#allocation10 + $0xd4] sm:$0xf]  ;;  %v2319_v19 = vld [vmem:[#allocation10 + $0xd8] sm:$0xf0]  ;;  %1274 = vmatpush.bf16.msrb.mxu2 %v2250_v17  ;;  %v2571_v17 = vld [vmem:[#allocation10 + $0x4] sm:$0xf] }
  0xdf   :  { %v413_v21 = vpop.f32.mrf.mxu2 }
  0xe0   :  { %v414_v23 = vadd.f32 %v413_v21, %v3046_v9  ;;  %v432_v24 = vpop.f32.mrf.mxu3  ;;  %853 = vmatmul.bf16.gmra.mxu0 %v445_v20  ;;  %891 = vmatmul.bf16.gmra.mxu2 %v445_v20  ;;  %v2317_v21 = vld [vmem:[#allocation10 + $0xd0] sm:$0xf] }
  0xe2   :  { %v433_v25 = vadd.f32 %v432_v24, %v414_v23  ;;  %v2318_v23 = vor.u32 %v2598_v22, %v2317_v21  ;;  %v2237_v24 = vld [vmem:[#allocation10 + $0x30] sm:$0xf] }
  0xe4   :  { %v442_v27 = vmax.f32 %v433_v25, 0.0  ;;  %v2578_v25 = vld [vmem:[#allocation10 + $0x34] sm:$0xf0] }
  0xe6   :  { %v446_v28 = vpack.c.bf16 %v442_v27, %v440_v26  ;;  %v2238_v26 = vor.u32 %v2578_v25, %v2237_v24  ;;  %v2577_v27 = vld [vmem:[#allocation10 + $0x34] sm:$0xf]  ;;  %v2287_v24 = vld [vmem:[#allocation10 + $0x98] sm:$0xf0] }
  0xe8   :  { %872 = vmatmul.bf16.gmra.mxu1 %v446_v28  ;;  %910 = vmatmul.bf16.gmra.mxu3 %v446_v28 }
  0xf0   :  { %924 = vmatmul.bf16.vlgmr.msra.gmra.mxu0 %v443_v54  ;;  %962 = vmatmul.bf16.vlgmr.msra.gmra.mxu2 %v443_v54  ;;  %v2334_v54 = vor.u32 %v2602_v53, %v2333_v51  ;;  %v2234_v51 = vor.u32 %v2575_v43, %v2231_v48  ;;  %v2593_v53 = vld [vmem:[#allocation10 + $0xb4] sm:$0xf] }
  0xf2   :  { %1252 = vmatpush.bf16.msrb.mxu1 %v2334_v54  ;;  %v2303_v54 = vld [vmem:[#allocation10 + $0xb8] sm:$0xf0] }
  0xf3   :  { %v2306_v55 = vor.u32 %v2593_v53, %v2303_v54 }
  0xf6   :  { %1253 = vmatpush.bf16.msrb.mxu1 %v2326_v7  ;;  %v2298_v7 = vor.u32 %v2591_v2, %v2295_v3 }
  0xf8   :  { %943 = vmatmul.bf16.vlgmr.msra.gmra.mxu1 %v444_v8  ;;  %981 = vmatmul.bf16.vlgmr.msra.gmra.mxu3 %v444_v8  ;;  %v2245_v8 = vld [vmem:[#allocation10 + $0x40] sm:$0xf] }
  0xf9   :  { %v2246_v13 = vor.u32 %v2580_v10, %v2245_v8  ;;  %v2592_v8 = vld [vmem:[#allocation10 + $0xa4] sm:$0xf0] }
  0xfa   :  { %1254 = vmatpush.bf16.msrb.mxu1 %v2318_v23 }
  0xfb   :  { %1236 = vmatpush.bf16.msrb.mxu0 %v2246_v13 }
  0xff   :  { %1237 = vmatpush.bf16.msrb.mxu0 %v2238_v26  ;;  %v2285_v26 = vld [vmem:[#allocation10 + $0x90] sm:$0xf] }
 0x100   :  { %929 = vmatmul.bf16.gmra.mxu0 %v445_v20  ;;  %967 = vmatmul.bf16.gmra.mxu2 %v445_v20  ;;  %v2322_v20 = vor.u32 %v2597_v18, %v2319_v19 }
 0x102   :  { %1292 = vmatpush.bf16.msrb.mxu3 %v2322_v20  ;;  %v2215_v20 = vld [vmem:[#allocation10 + $0x8] sm:$0xf0] }
 0x103   :  { %v2218_v23 = vor.u32 %v2571_v17, %v2215_v20  ;;  %v2399_v20 = vld [vmem:[#allocation11 + $0x78] sm:$0xf0] }
 0x106   :  { %1293 = vmatpush.bf16.msrb.mxu3 %v2314_v35  ;;  %v2282_v35 = vor.u32 %v2587_v31, %v2279_v32 }
 0x108   :  { %948 = vmatmul.bf16.gmra.mxu1 %v446_v28  ;;  %986 = vmatmul.bf16.gmra.mxu3 %v446_v28  ;;  %v2239_v28 = vld [vmem:[#allocation10 + $0x38] sm:$0xf0] }
 0x109   :  { %v2242_v30 = vor.u32 %v2577_v27, %v2239_v28  ;;  %v2590_v27 = vld [vmem:[#allocation10 + $0x94] sm:$0xf0]  ;;  %v3092_v28 = vperm.slane %v3055_v52, 2 }
 0x10a   :  { %1294 = vmatpush.bf16.msrb.mxu3 %v2306_v55 }
 0x10b   :  { %1275 = vmatpush.bf16.msrb.mxu2 %v2242_v30 }
 0x10e   :  { %1295 = vmatpush.bf16.msrb.mxu3 %v2298_v7  ;;  %v152_v7 = vld [vmem:[#allocation5 + $0x10] sm:$0xff] }
 0x10f   :  { %1276 = vmatpush.bf16.msrb.mxu2 %v2234_v51 }
 0x14d   :  { %v849_v9 = vpop.f32.mrf.mxu0 }
 0x14e   :  { %v850_v36 = vadd.f32 %v849_v9, %v3058_v29 }
 0x153   :  { %v887_v37 = vpop.f32.mrf.mxu2 }
 0x154   :  { %v888_v60 = vadd.f32 %v887_v37, %v3064_v45 }
 0x155   :  { %v868_v41 = vpop.f32.mrf.mxu1  ;;  %v851_v46 = vpop.f32.mrf.mxu0 }
 0x156   :  { %v3061_v44 = vadd.f32 %v868_v41, %v850_v36  ;;  %v852_v4 = vadd.f32 %v851_v46, %v3058_v29  ;;  %v2596_v36 = vld [vmem:[#allocation10 + $0xc4] sm:$0xf0]  ;;  %v2229_v41 = vld [vmem:[#allocation10 + $0x20] sm:$0xf] }
 0x157   :  { %v2310_v40 = vor.u32 %v2596_v36, %v2309_v33  ;;  %v2230_v47 = vor.u32 %v2576_v42, %v2229_v41  ;;  %v2277_v33 = vld [vmem:[#allocation10 + $0x80] sm:$0xf]  ;;  %v2588_v36 = vld [vmem:[#allocation10 + $0x84] sm:$0xf0] }
 0x158   :  { %1754 = vst [vmem:[#allocation15] sm:$0xff] %v3061_v44  ;;  %v2278_v41 = vor.u32 %v2588_v36, %v2277_v33  ;;  %v2391_v33 = vld [vmem:[#allocation11 + $0x68] sm:$0xf0] }
 0x159   :  { %1255 = vmatpush.bf16.msrb.mxu1 %v2310_v40  ;;  %1238 = vmatpush.bf16.msrb.mxu0 %v2230_v47 }
 0x15b   :  { %v906_v1 = vpop.f32.mrf.mxu3  ;;  %v889_v6 = vpop.f32.mrf.mxu2 }
 0x15c   :  { %v3069_v5 = vadd.f32 %v906_v1, %v888_v60  ;;  %v890_v9 = vadd.f32 %v889_v6, %v3064_v45  ;;  %v2574_v60 = vld [vmem:[#allocation10 + $0x14] sm:$0xf0]  ;;  %v2226_v1 = vor.u32 %v2573_v62, %v2223_v63 }
 0x15d   :  { %v870_v12 = vpop.f32.mrf.mxu1  ;;  %v854_v16 = vpop.f32.mrf.mxu0  ;;  %v2222_v61 = vor.u32 %v2574_v60, %v2221_v59  ;;  %1256 = vmatpush.bf16.msrb.mxu1 %v2302_v58 }
 0x15e   :  { %1755 = vst [vmem:[#allocation15 + $0x8] sm:$0xff] %v3069_v5  ;;  %v3072_v15 = vadd.f32 %v870_v12, %v852_v4  ;;  %v855_v37 = vadd.f32 %v854_v16, %v3058_v29  ;;  %v2293_v4 = vld [vmem:[#allocation10 + $0xa0] sm:$0xf]  ;;  %1277 = vmatpush.bf16.msrb.mxu2 %v2226_v1  ;;  %v2572_v16 = vld [vmem:[#allocation10 + $0x4] sm:$0xf0] }
 0x15f   :  { %1239 = vmatpush.bf16.msrb.mxu0 %v2222_v61  ;;  %v2294_v13 = vor.u32 %v2592_v8, %v2293_v4  ;;  %v2214_v19 = vor.u32 %v2572_v16, %v2213_v14  ;;  %v2617_v14 = vld [vmem:[#allocation11 + $0x74] sm:$0xf]  ;;  %v151_v16 = vld [vmem:[#allocation5 + $0x8] sm:$0xff] }
 0x160   :  { %1756 = vst [vmem:[#allocation15 + $0x10] sm:$0xff] %v3072_v15 }
 0x161   :  { %1257 = vmatpush.bf16.msrb.mxu1 %v2294_v13  ;;  %v2618_v13 = vld [vmem:[#allocation11 + $0x74] sm:$0xf0] }
 0x162   :  { %1278 = vmatpush.bf16.msrb.mxu2 %v2218_v23 }
 0x163   :  { %v908_v34 = vpop.f32.mrf.mxu3  ;;  %v892_v39 = vpop.f32.mrf.mxu2  ;;  %1240 = vmatpush.bf16.msrb.mxu0 %v2214_v19 }
 0x164   :  { %v3077_v38 = vadd.f32 %v908_v34, %v890_v9  ;;  %v893_v0 = vadd.f32 %v892_v39, %v3064_v45  ;;  %v2286_v9 = vor.u32 %v2590_v27, %v2285_v26  ;;  %v2616_v26 = vld [vmem:[#allocation11 + $0x64] sm:$0xf0]  ;;  %v2615_v27 = vld [vmem:[#allocation11 + $0x64] sm:$0xf] }
 0x165   :  { %v873_v46 = vpop.f32.mrf.mxu1  ;;  %v856_v50 = vpop.f32.mrf.mxu0 }
 0x166   :  { %1757 = vst [vmem:[#allocation15 + $0x18] sm:$0xff] %v3077_v38  ;;  %v3080_v49 = vadd.f32 %v873_v46, %v855_v37  ;;  %v857_v10 = vadd.f32 %v856_v50, %v3058_v29  ;;  %v2589_v29 = vld [vmem:[#allocation10 + $0x94] sm:$0xf]  ;;  %1258 = vmatpush.bf16.msrb.mxu1 %v2286_v9 }
 0x167   :  { %v2290_v25 = vor.u32 %v2589_v29, %v2287_v24  ;;  %v2402_v24 = vor.u32 %v2617_v14, %v2399_v20 }
 0x168   :  { %1758 = vst [vmem:[#allocation15 + $0x20] sm:$0xff] %v3080_v49 }
 0x169   :  { %1296 = vmatpush.bf16.msrb.mxu3 %v2290_v25  ;;  %v2389_v25 = vld [vmem:[#allocation11 + $0x60] sm:$0xf]  ;;  %1556 = vmatpush.bf16.msra.mxu2 %v2402_v24 }
 0x16a   :  { %1259 = vmatpush.bf16.msrb.mxu1 %v2278_v41  ;;  %v2390_v32 = vor.u32 %v2616_v26, %v2389_v25  ;;  %v2461_v41 = vld [vmem:[#allocation11 + $0xf0] sm:$0xf]  ;;  %v157_v25 = vld [vmem:[#allocation5 + $0x38] sm:$0xff] }
 0x16b   :  { %v911_v6 = vpop.f32.mrf.mxu3  ;;  %v894_v12 = vpop.f32.mrf.mxu2 }
 0x16c   :  { %v3085_v11 = vadd.f32 %v911_v6, %v893_v0  ;;  %v895_v30 = vadd.f32 %v894_v12, %v3064_v45  ;;  %v3100_v45 = vperm.slane %v3055_v52, 3  ;;  %v150_v6 = vld [vmem:[#allocation5] sm:$0xff]  ;;  %v2397_v12 = vld [vmem:[#allocation11 + $0x70] sm:$0xf] }
 0x16d   :  { %v875_v18 = vpop.f32.mrf.mxu1  ;;  %v925_v22 = vpop.f32.mrf.mxu0  ;;  %1297 = vmatpush.bf16.msrb.mxu3 %v2282_v35  ;;  %v2398_v19 = vor.u32 %v2618_v13, %v2397_v12 }
 0x16e   :  { %1759 = vst [vmem:[#allocation15 + $0x28] sm:$0xff] %v3085_v11  ;;  %v3088_v21 = vadd.f32 %v875_v18, %v857_v10  ;;  %v926_v37 = vadd.f32 %v925_v22, %v3092_v28 }
 0x16f   :  { %1518 = vmatpush.bf16.msra.mxu0 %v2398_v19 }
 0x170   :  { %1760 = vst [vmem:[#allocation15 + $0x30] sm:$0xff] %v3088_v21 }
 0x173   :  { %v913_v34 = vpop.f32.mrf.mxu3  ;;  %v963_v40 = vpop.f32.mrf.mxu2  ;;  %1519 = vmatpush.bf16.msra.mxu0 %v2390_v32 }
 0x174   :  { %v3096_v39 = vadd.f32 %v913_v34, %v895_v30  ;;  %v964_v48 = vadd.f32 %v963_v40, %v3100_v45  ;;  %v2633_v34 = vld [vmem:[#allocation11 + $0xf4] sm:$0xf]  ;;  %v2463_v40 = vld [vmem:[#allocation11 + $0xf8] sm:$0xf0] }
 0x175   :  { %v944_v42 = vpop.f32.mrf.mxu1  ;;  %v927_v46 = vpop.f32.mrf.mxu0 }
 0x176   :  { %1761 = vst [vmem:[#allocation15 + $0x38] sm:$0xff] %v3096_v39  ;;  %v945_v43 = vadd.f32 %v944_v42, %v926_v37  ;;  %v928_v53 = vadd.f32 %v927_v46, %v3092_v28  ;;  %v2394_v37 = vor.u32 %v2615_v27, %v2391_v33  ;;  %v2634_v42 = vld [vmem:[#allocation11 + $0xf4] sm:$0xf0] }
 0x177   :  { %1795 = dma.vmem_to_hbm [thread:$0]  %s1788_s24, 1024, %s1790_s3, [#allocation16], %s2950_s17, %s2950_s17, %s2951_s18  }
 0x178   :  { %v992_v47 = vmul.f32 0.5, %v945_v43  ;;  %1762 = vst [vmem:[#allocation17] sm:$0xff] %v945_v43  ;;  %1557 = vmatpush.bf16.msra.mxu2 %v2394_v37  ;;  %v2612_v37 = vld [vmem:[#allocation11 + $0x44] sm:$0xf0] }
 0x17a   :  { %v1000_v51 = vmul.f32 1.442695, %v992_v47  ;;  %v2466_v47 = vor.u32 %v2633_v34, %v2463_v40  ;;  %v2453_v34 = vld [vmem:[#allocation11 + $0xe0] sm:$0xf] }
 0x17b   :  { %v982_v50 = vpop.f32.mrf.mxu3  ;;  %v965_v55 = vpop.f32.mrf.mxu2 }
 0x17c   :  { %v983_v54 = vadd.f32 %v982_v50, %v964_v48  ;;  %2649 = vpow2.f32 %v1000_v51  ;;  %v966_v62 = vadd.f32 %v965_v55, %v3100_v45  ;;  %v2462_v48 = vor.u32 %v2634_v42, %v2461_v41  ;;  %v2381_v50 = vld [vmem:[#allocation11 + $0x50] sm:$0xf]  ;;  %v2614_v51 = vld [vmem:[#allocation11 + $0x54] sm:$0xf0]  ;;  %1575 = vmatpush.bf16.msra.mxu3 %v2466_v47  ;;  %v2375_v41 = vld [vmem:[#allocation11 + $0x48] sm:$0xf0] }
 0x17d   :  { %v946_v56 = vpop.f32.mrf.mxu1  ;;  %v930_v59 = vpop.f32.mrf.mxu0  ;;  %v2629_v42 = vld [vmem:[#allocation11 + $0xd4] sm:$0xf] }
 0x17e   :  { %v993_v57 = vmul.f32 0.5, %v983_v54  ;;  %1763 = vst [vmem:[#allocation17 + $0x8] sm:$0xff] %v983_v54  ;;  %v947_v58 = vadd.f32 %v946_v56, %v928_v53  ;;  %v931_v0 = vadd.f32 %v930_v59, %v3092_v28  ;;  %v2613_v53 = vld [vmem:[#allocation11 + $0x54] sm:$0xf]  ;;  %v2631_v59 = vld [vmem:[#allocation11 + $0xe4] sm:$0xf]  ;;  %1537 = vmatpush.bf16.msra.mxu1 %v2462_v48 }
 0x17f   :  { %v2445_v48 = vld [vmem:[#allocation11 + $0xd0] sm:$0xf] }
 0x180   :  { %v1002_v52 = vmul.f32 1.442695, %v993_v57  ;;  %v994_v60 = vmul.f32 0.5, %v947_v58  ;;  %1764 = vst [vmem:[#allocation17 + $0x10] sm:$0xff] %v947_v58  ;;  %v2383_v58 = vld [vmem:[#allocation11 + $0x58] sm:$0xf0] }
 0x182   :  { %v1004_v61 = vmul.f32 1.442695, %v994_v60  ;;  %2651 = vpow2.f32 %v1002_v52  ;;  %v2650_v4 = vpop.eup %2649  ;;  %v2455_v52 = vld [vmem:[#allocation11 + $0xe8] sm:$0xf0]  ;;  %v153_v60 = vld [vmem:[#allocation5 + $0x18] sm:$0xff] }
 0x183   :  { %v984_v63 = vpop.f32.mrf.mxu3  ;;  %v968_v3 = vpop.f32.mrf.mxu2  ;;  %v1016_v23 = vmul.f32 %v2650_v4, %v150_v6 }
 0x184   :  { %2653 = vpow2.f32 %v1004_v61  ;;  %v985_v1 = vadd.f32 %v984_v63, %v966_v62  ;;  %v969_v31 = vadd.f32 %v968_v3, %v3100_v45 }
 0x185   :  { %v949_v2 = vpop.f32.mrf.mxu1  ;;  %v932_v29 = vpop.f32.mrf.mxu0  ;;  %v1024_v56 = vadd.f32 %v1016_v23, %v3061_v44 }
 0x186   :  { %v995_v8 = vmul.f32 0.5, %v985_v1  ;;  %1765 = vst [vmem:[#allocation17 + $0x18] sm:$0xff] %v985_v1  ;;  %v950_v10 = vadd.f32 %v949_v2, %v931_v0  ;;  %v933_v43 = vadd.f32 %v932_v29, %v3092_v28  ;;  %v2382_v28 = vor.u32 %v2614_v51, %v2381_v50  ;;  %v155_v29 = vld [vmem:[#allocation5 + $0x28] sm:$0xff]  ;;  %v2365_v50 = vld [vmem:[#allocation11 + $0x30] sm:$0xf] }
 0x187   :  { %v2386_v1 = vor.u32 %v2613_v53, %v2383_v58  ;;  %v2458_v2 = vor.u32 %v2631_v59, %v2455_v52  ;;  %v2610_v51 = vld [vmem:[#allocation11 + $0x34] sm:$0xf0]  ;;  %v2609_v53 = vld [vmem:[#allocation11 + $0x34] sm:$0xf]  ;;  %v2439_v58 = vld [vmem:[#allocation11 + $0xc8] sm:$0xf0] }
 0x188   :  { %v1006_v17 = vmul.f32 1.442695, %v995_v8  ;;  %v996_v18 = vmul.f32 0.5, %v950_v10  ;;  %1766 = vst [vmem:[#allocation17 + $0x20] sm:$0xff] %v950_v10  ;;  %v2652_v22 = vpop.eup %2651  ;;  %1520 = vmatpush.bf16.msra.mxu0 %v2382_v28  ;;  %v2437_v52 = vld [vmem:[#allocation11 + $0xc0] sm:$0xf] }
 0x189   :  { %v1017_v54 = vmul.f32 %v2652_v22, %v151_v16  ;;  %1576 = vmatpush.bf16.msra.mxu3 %v2458_v2  ;;  %1558 = vmatpush.bf16.msra.mxu2 %v2386_v1  ;;  %v2608_v28 = vld [vmem:[#allocation11 + $0x24] sm:$0xf0]  ;;  %v2359_v1 = vld [vmem:[#allocation11 + $0x28] sm:$0xf0]  ;;  %v2625_v2 = vld [vmem:[#allocation11 + $0xb4] sm:$0xf] }
 0x18a   :  { %v2654_v9 = vpop.eup %2653  ;;  %2655 = vpow2.f32 %v1006_v17  ;;  %v1008_v30 = vmul.f32 1.442695, %v996_v18  ;;  %v154_v18 = vld [vmem:[#allocation5 + $0x20] sm:$0xff] }
 0x18b   :  { %v1018_v35 = vmul.f32 %v2654_v9, %v152_v7  ;;  %v987_v36 = vpop.f32.mrf.mxu3  ;;  %v970_v63 = vpop.f32.mrf.mxu2  ;;  %v1025_v10 = vadd.f32 %v1017_v54, %v3069_v5  ;;  %v2366_v54 = vor.u32 %v2610_v51, %v2365_v50 }
 0x18c   :  { %v988_v46 = vadd.f32 %v987_v36, %v969_v31  ;;  %2657 = vpow2.f32 %v1008_v30  ;;  %v971_v7 = vadd.f32 %v970_v63, %v3100_v45  ;;  %v156_v45 = vld [vmem:[#allocation5 + $0x30] sm:$0xff]  ;;  %v2607_v63 = vld [vmem:[#allocation11 + $0x24] sm:$0xf] }
 0x18d   :  { %v951_v55 = vpop.f32.mrf.mxu1  ;;  %v1026_v57 = vadd.f32 %v1018_v35, %v3072_v15  ;;  %v2632_v35 = vld [vmem:[#allocation11 + $0xe4] sm:$0xf0] }
 0x18e   :  { %v997_v61 = vmul.f32 0.5, %v988_v46  ;;  %1767 = vst [vmem:[#allocation17 + $0x28] sm:$0xff] %v988_v46  ;;  %v952_v62 = vadd.f32 %v951_v55, %v933_v43  ;;  %v2454_v36 = vor.u32 %v2632_v35, %v2453_v34  ;;  %v2447_v43 = vld [vmem:[#allocation11 + $0xd8] sm:$0xf0]  ;;  %v2407_v34 = vld [vmem:[#allocation11 + $0x88] sm:$0xf0] }
 0x18f   :  { %v1032_v0 = vpack.c.bf16 %v1026_v57, %v1024_v56  ;;  %v2450_v47 = vor.u32 %v2629_v42, %v2447_v43  ;;  %v2367_v55 = vld [vmem:[#allocation11 + $0x38] sm:$0xf0]  ;;  %v2627_v57 = vld [vmem:[#allocation11 + $0xc4] sm:$0xf]  ;;  %v2405_v35 = vld [vmem:[#allocation11 + $0x80] sm:$0xf] }
 0x190   :  { %v2656_v3 = vpop.eup %2655  ;;  %v998_v44 = vmul.f32 0.5, %v952_v62  ;;  %1768 = vst [vmem:[#allocation17 + $0x30] sm:$0xff] %v952_v62  ;;  %v1010_v4 = vmul.f32 1.442695, %v997_v61  ;;  %1538 = vmatpush.bf16.msra.mxu1 %v2454_v36  ;;  %v2370_v56 = vor.u32 %v2609_v53, %v2367_v55  ;;  %v2442_v59 = vor.u32 %v2627_v57, %v2439_v58  ;;  %v2357_v62 = vld [vmem:[#allocation11 + $0x20] sm:$0xf] }
 0x191   :  { %v1019_v15 = vmul.f32 %v2656_v3, %v153_v60  ;;  %1241 = vmatmul.bf16.vlgmr.msrb.gmra.mxu0 %v1032_v0  ;;  %1279 = vmatmul.bf16.vlgmr.msrb.gmra.mxu2 %v1032_v0  ;;  %v2628_v60 = vld [vmem:[#allocation11 + $0xc4] sm:$0xf0]  ;;  %v2358_v0 = vor.u32 %v2608_v28, %v2357_v62  ;;  %v2431_v3 = vld [vmem:[#allocation11 + $0xb8] sm:$0xf0] }
 0x192   :  { %v1012_v6 = vmul.f32 1.442695, %v998_v44  ;;  %v2658_v16 = vpop.eup %2657  ;;  %1577 = vmatpush.bf16.msra.mxu3 %v2450_v47  ;;  %v2438_v61 = vor.u32 %v2628_v60, %v2437_v52  ;;  %v2362_v44 = vor.u32 %v2607_v63, %v2359_v1 }
 0x193   :  { %v989_v8 = vpop.f32.mrf.mxu3  ;;  %v1027_v12 = vadd.f32 %v1019_v15, %v3077_v38  ;;  %v1020_v20 = vmul.f32 %v2658_v16, %v154_v18  ;;  %v2434_v15 = vor.u32 %v2625_v2, %v2431_v3  ;;  %v2423_v18 = vld [vmem:[#allocation11 + $0xa8] sm:$0xf0] }
 0x194   :  { %2659 = vpow2.f32 %v1012_v6  ;;  %v990_v13 = vadd.f32 %v989_v8, %v971_v7  ;;  %v2626_v6 = vld [vmem:[#allocation11 + $0xb4] sm:$0xf0]  ;;  %v2349_v8 = vld [vmem:[#allocation11 + $0x10] sm:$0xf] }
 0x195   :  { %v1033_v14 = vpack.c.bf16 %v1027_v12, %v1025_v10  ;;  %2661 = vpow2.f32 %v1010_v4  ;;  %v1028_v38 = vadd.f32 %v1020_v20, %v3080_v49  ;;  %v2373_v49 = vld [vmem:[#allocation11 + $0x40] sm:$0xf]  ;;  %v2429_v4 = vld [vmem:[#allocation11 + $0xb0] sm:$0xf]  ;;  %v2606_v10 = vld [vmem:[#allocation11 + $0x14] sm:$0xf0] }
 0x196   :  { %v999_v17 = vmul.f32 0.5, %v990_v13  ;;  %1769 = vst [vmem:[#allocation17 + $0x38] sm:$0xff] %v990_v13  ;;  %v2374_v40 = vor.u32 %v2612_v37, %v2373_v49  ;;  %1578 = vmatpush.bf16.msra.mxu3 %v2442_v59  ;;  %v2430_v7 = vor.u32 %v2626_v6, %v2429_v4  ;;  %v2605_v12 = vld [vmem:[#allocation11 + $0x14] sm:$0xf]  ;;  %v2350_v13 = vor.u32 %v2606_v10, %v2349_v8  ;;  %v2624_v20 = vld [vmem:[#allocation11 + $0xa4] sm:$0xf0] }
 0x197   :  { %1260 = vmatmul.bf16.vlgmr.msrb.gmra.mxu1 %v1033_v14  ;;  %1298 = vmatmul.bf16.vlgmr.msrb.gmra.mxu3 %v1033_v14  ;;  %v2351_v14 = vld [vmem:[#allocation11 + $0x18] sm:$0xf0]  ;;  %v2620_v49 = vld [vmem:[#allocation11 + $0x84] sm:$0xf0]  ;;  %1808 = dma.vmem_to_hbm [thread:$0]  %s1801_s29, 1024, %s1803_s27, [#allocation16], %s2950_s17, %s2950_s17, %s2951_s18  }
 0x198   :  { %v1014_v19 = vmul.f32 1.442695, %v999_v17  ;;  %1521 = vmatpush.bf16.msra.mxu0 %v2374_v40  ;;  %v2354_v16 = vor.u32 %v2605_v12, %v2351_v14  ;;  %v2623_v17 = vld [vmem:[#allocation11 + $0xa4] sm:$0xf]  ;;  %v2406_v37 = vor.u32 %v2620_v49, %v2405_v35 }
 0x199   :  { %v140_v40 = vld [vmem:[#allocation13 + $0x6] sm:$0x3] }
 0x19a   :  { %v2660_v22 = vpop.eup %2659  ;;  %2663 = vpow2.f32 %v1014_v19  ;;  %1579 = vmatpush.bf16.msra.mxu3 %v2434_v15  ;;  %v2421_v19 = vld [vmem:[#allocation11 + $0xa0] sm:$0xf]  ;;  %v1069_v43 = vperm.slane %v140_v40, 0 }
 0x19b   :  { %v1022_v23 = vmul.f32 %v2660_v22, %v156_v45  ;;  %v2662_v5 = vpop.eup %2661  ;;  %v2426_v45 = vor.u32 %v2623_v17, %v2423_v18  ;;  %v2422_v22 = vor.u32 %v2624_v20, %v2421_v19 }
 0x19c   :  { %v1021_v27 = vmul.f32 %v2662_v5, %v155_v29  ;;  %1522 = vmatpush.bf16.msra.mxu0 %v2366_v54  ;;  %v2604_v5 = vld [vmem:[#allocation11 + $0x4] sm:$0xf0]  ;;  %v2603_v29 = vld [vmem:[#allocation11 + $0x4] sm:$0xf] }
 0x19d   :  { %v1030_v24 = vadd.f32 %v1022_v23, %v3088_v21  ;;  %v2611_v21 = vld [vmem:[#allocation11 + $0x44] sm:$0xf]  ;;  %v2341_v23 = vld [vmem:[#allocation11] sm:$0xf] }
 0x19e   :  { %v1029_v31 = vadd.f32 %v1021_v27, %v3085_v11  ;;  %v2378_v46 = vor.u32 %v2611_v21, %v2375_v41  ;;  %v2630_v11 = vld [vmem:[#allocation11 + $0xd4] sm:$0xf0]  ;;  %1580 = vmatpush.bf16.msra.mxu3 %v2426_v45  ;;  %v2415_v27 = vld [vmem:[#allocation11 + $0x98] sm:$0xf0] }
 0x19f   :  { %v1034_v26 = vpack.c.bf16 %v1030_v24, %v1028_v38  ;;  %v2342_v38 = vor.u32 %v2604_v5, %v2341_v23  ;;  %v2343_v24 = vld [vmem:[#allocation11 + $0x8] sm:$0xf0]  ;;  %v141_v5 = vld [vmem:[#allocation13 + $0x8] sm:$0x3] }
 0x1a0   :  { %v2664_v9 = vpop.eup %2663  ;;  %1559 = vmatpush.bf16.msra.mxu2 %v2378_v46  ;;  %1523 = vmatpush.bf16.msra.mxu0 %v2358_v0 }
 0x1a1   :  { %1246 = vmatmul.bf16.gmra.mxu0 %v1034_v26  ;;  %1284 = vmatmul.bf16.gmra.mxu2 %v1034_v26  ;;  %v1023_v30 = vmul.f32 %v2664_v9, %v157_v25  ;;  %v2346_v25 = vor.u32 %v2603_v29, %v2343_v24  ;;  %v2621_v26 = vld [vmem:[#allocation11 + $0x94] sm:$0xf]  ;;  %v2413_v9 = vld [vmem:[#allocation11 + $0x90] sm:$0xf] }
 0x1a3   :  { %v1031_v32 = vadd.f32 %v1023_v30, %v3096_v39  ;;  %v2446_v39 = vor.u32 %v2630_v11, %v2445_v48  ;;  %v2418_v30 = vor.u32 %v2621_v26, %v2415_v27 }
 0x1a4   :  { %1560 = vmatpush.bf16.msra.mxu2 %v2370_v56  ;;  %1524 = vmatpush.bf16.msra.mxu0 %v2350_v13 }
 0x1a5   :  { %v1035_v33 = vpack.c.bf16 %v1031_v32, %v1029_v31  ;;  %1539 = vmatpush.bf16.msra.mxu1 %v2446_v39  ;;  %v2622_v31 = vld [vmem:[#allocation11 + $0x94] sm:$0xf0]  ;;  %1581 = vmatpush.bf16.msra.mxu3 %v2418_v30  ;;  %v1070_v39 = vperm.slane %v140_v40, 1 }
 0x1a6   :  { %v2414_v32 = vor.u32 %v2622_v31, %v2413_v9  ;;  %v3129_v9 = vperm.slane %v141_v5, 1 }
 0x1a7   :  { %1265 = vmatmul.bf16.gmra.mxu1 %v1035_v33  ;;  %1303 = vmatmul.bf16.gmra.mxu3 %v1035_v33  ;;  %v2619_v33 = vld [vmem:[#allocation11 + $0x84] sm:$0xf] }
 0x1a8   :  { %1561 = vmatpush.bf16.msra.mxu2 %v2362_v44  ;;  %1525 = vmatpush.bf16.msra.mxu0 %v2342_v38  ;;  %v2410_v36 = vor.u32 %v2619_v33, %v2407_v34  ;;  %v1354_v38 = vperm.slane %v141_v5, 0 }
 0x1a9   :  { %1540 = vmatpush.bf16.msra.mxu1 %v2438_v61 }
 0x1aa   :  { %1582 = vmatpush.bf16.msra.mxu3 %v2410_v36 }
 0x1ac   :  { %1562 = vmatpush.bf16.msra.mxu2 %v2354_v16 }
 0x1ad   :  { %1541 = vmatpush.bf16.msra.mxu1 %v2430_v7 }
 0x1b0   :  { %1563 = vmatpush.bf16.msra.mxu2 %v2346_v25 }
 0x1b1   :  { %1542 = vmatpush.bf16.msra.mxu1 %v2422_v22 }
 0x1b5   :  { %1543 = vmatpush.bf16.msra.mxu1 %v2414_v32 }
 0x1b9   :  { %1544 = vmatpush.bf16.msra.mxu1 %v2406_v37 }
 0x20e   :  { %v1242_v21 = vpop.f32.mrf.mxu0 }
 0x20f   :  { %v1243_v47 = vadd.f32 %v1242_v21, %v1069_v43 }
 0x214   :  { %v1261_v41 = vpop.f32.mrf.mxu1  ;;  %v1280_v42 = vpop.f32.mrf.mxu2 }
 0x215   :  { %v1262_v11 = vadd.f32 %v1261_v41, %v1243_v47  ;;  %v1281_v57 = vadd.f32 %v1280_v42, %v1070_v39 }
 0x216   :  { %v1244_v46 = vpop.f32.mrf.mxu0 }
 0x217   :  { %v1245_v50 = vadd.f32 %v1244_v46, %v1069_v43  ;;  %v1309_v56 = vmax.f32 %v1262_v11, 0.0 }
 0x21a   :  { %v1299_v48 = vpop.f32.mrf.mxu3 }
 0x21b   :  { %v1300_v59 = vadd.f32 %v1299_v48, %v1281_v57 }
 0x21c   :  { %v1263_v51 = vpop.f32.mrf.mxu1  ;;  %v1282_v53 = vpop.f32.mrf.mxu2 }
 0x21d   :  { %v1264_v54 = vadd.f32 %v1263_v51, %v1245_v50  ;;  %v1283_v60 = vadd.f32 %v1282_v53, %v1070_v39  ;;  %v1310_v0 = vmax.f32 %v1300_v59, 0.0 }
 0x21e   :  { %v1247_v55 = vpop.f32.mrf.mxu0 }
 0x21f   :  { %v1311_v58 = vmax.f32 %v1264_v54, 0.0  ;;  %v1248_v44 = vadd.f32 %v1247_v55, %v1069_v43 }
 0x221   :  { %v1317_v52 = vpack.c.bf16 %v1311_v58, %v1309_v56 }
 0x222   :  { %v1301_v61 = vpop.f32.mrf.mxu3 }
 0x223   :  { %v1302_v62 = vadd.f32 %v1301_v61, %v1283_v60  ;;  %1526 = vmatmul.bf16.vlgmr.msra.gmra.mxu0 %v1317_v52  ;;  %1564 = vmatmul.bf16.vlgmr.msra.gmra.mxu2 %v1317_v52 }
 0x224   :  { %v1266_v28 = vpop.f32.mrf.mxu1  ;;  %v1285_v63 = vpop.f32.mrf.mxu2 }
 0x225   :  { %v1312_v1 = vmax.f32 %v1302_v62, 0.0  ;;  %v1267_v4 = vadd.f32 %v1266_v28, %v1248_v44  ;;  %v1286_v13 = vadd.f32 %v1285_v63, %v1070_v39 }
 0x226   :  { %v1249_v3 = vpop.f32.mrf.mxu0 }
 0x227   :  { %v1318_v2 = vpack.c.bf16 %v1312_v1, %v1310_v0  ;;  %v1250_v6 = vadd.f32 %v1249_v3, %v1069_v43  ;;  %v1313_v12 = vmax.f32 %v1267_v4, 0.0 }
 0x229   :  { %1545 = vmatmul.bf16.vlgmr.msra.gmra.mxu1 %v1318_v2  ;;  %1583 = vmatmul.bf16.vlgmr.msra.gmra.mxu3 %v1318_v2 }
 0x22a   :  { %v1304_v15 = vpop.f32.mrf.mxu3 }
 0x22b   :  { %v1305_v16 = vadd.f32 %v1304_v15, %v1286_v13 }
 0x22c   :  { %v1268_v7 = vpop.f32.mrf.mxu1  ;;  %v1287_v10 = vpop.f32.mrf.mxu2 }
 0x22d   :  { %v1269_v8 = vadd.f32 %v1268_v7, %v1250_v6  ;;  %v1288_v17 = vadd.f32 %v1287_v10, %v1070_v39  ;;  %v1314_v20 = vmax.f32 %v1305_v16, 0.0 }
 0x22f   :  { %v1315_v14 = vmax.f32 %v1269_v8, 0.0 }
 0x231   :  { %v1319_v18 = vpack.c.bf16 %v1315_v14, %v1313_v12 }
 0x232   :  { %v1306_v19 = vpop.f32.mrf.mxu3 }
 0x233   :  { %v1307_v45 = vadd.f32 %v1306_v19, %v1288_v17  ;;  %1531 = vmatmul.bf16.gmra.mxu0 %v1319_v18  ;;  %1569 = vmatmul.bf16.gmra.mxu2 %v1319_v18 }
 0x235   :  { %v1316_v22 = vmax.f32 %v1307_v45, 0.0 }
 0x237   :  { %v1320_v23 = vpack.c.bf16 %v1316_v22, %v1314_v20 }
 0x239   :  { %1550 = vmatmul.bf16.gmra.mxu1 %v1320_v23  ;;  %1588 = vmatmul.bf16.gmra.mxu3 %v1320_v23 }
 0x2a0   :  { %v1527_v29 = vpop.f32.mrf.mxu0 }
 0x2a1   :  { %v1528_v24 = vadd.f32 %v1527_v29, %v1354_v38 }
 0x2a6   :  { %v1546_v25 = vpop.f32.mrf.mxu1  ;;  %v1565_v26 = vpop.f32.mrf.mxu2 }
 0x2a7   :  { %v1547_v27 = vadd.f32 %v1546_v25, %v1528_v24  ;;  %v1566_v32 = vadd.f32 %v1565_v26, %v3129_v9 }
 0x2a8   :  { %v1529_v30 = vpop.f32.mrf.mxu0 }
 0x2a9   :  { %v2467_v31 = vmul.f32 -1.442695, %v1547_v27  ;;  %v1530_v34 = vadd.f32 %v1529_v30, %v1354_v38 }
 0x2ab   :  { %2665 = vpow2.f32 %v2467_v31 }
 0x2ac   :  { %v1584_v33 = vpop.f32.mrf.mxu3 }
 0x2ad   :  { %v1585_v35 = vadd.f32 %v1584_v33, %v1566_v32 }
 0x2ae   :  { %v1548_v36 = vpop.f32.mrf.mxu1  ;;  %v1567_v49 = vpop.f32.mrf.mxu2 }
 0x2af   :  { %v2468_v37 = vmul.f32 -1.442695, %v1585_v35  ;;  %v1549_v21 = vadd.f32 %v1548_v36, %v1530_v34  ;;  %v1568_v46 = vadd.f32 %v1567_v49, %v3129_v9 }
 0x2b0   :  { %v1532_v40 = vpop.f32.mrf.mxu0 }
 0x2b1   :  { %v2666_v41 = vpop.eup %2665  ;;  %2667 = vpow2.f32 %v2468_v37  ;;  %v2469_v42 = vmul.f32 -1.442695, %v1549_v21  ;;  %v1533_v48 = vadd.f32 %v1532_v40, %v1354_v38 }
 0x2b2   :  { %v1618_v43 = vadd.f32 1.0, %v2666_v41 }
 0x2b3   :  { %2669 = vpow2.f32 %v2469_v42 }
 0x2b4   :  { %2671 = vrcp.f32 %v1618_v43  ;;  %v1586_v47 = vpop.f32.mrf.mxu3  ;;  %v1635_v0 = vand.u32 2147483647, %v1618_v43  ;;  %v1637_v1 = vand.u32 2147483648, %v1618_v43  ;;  %vm1631_vm1 = vweird.f32 %v1618_v43 }
 0x2b5   :  { %v1587_v11 = vadd.f32 %v1586_v47, %v1568_v46 }
 0x2b6   :  { %v1551_v39 = vpop.f32.mrf.mxu1  ;;  %v1570_v55 = vpop.f32.mrf.mxu2  ;;  %vm1636_vm3 = vcmp.eq.f32.partialorder %v1635_v0, 8.507059e+37  ;;  %v1638_v14 = vor.u32 1.1754944e-38, %v1637_v1 }
 0x2b7   :  { %v2668_v50 = vpop.eup %2667  ;;  %v2470_v51 = vmul.f32 -1.442695, %v1587_v11  ;;  %v1552_v53 = vadd.f32 %v1551_v39, %v1533_v48  ;;  %v1571_v61 = vadd.f32 %v1570_v55, %v3129_v9 }
 0x2b8   :  { %v3133_v54 = vadd.f32 1.0, %v2668_v50  ;;  %v1534_v59 = vpop.f32.mrf.mxu0 }
 0x2b9   :  { %v2670_v56 = vpop.eup %2669  ;;  %2673 = vpow2.f32 %v2470_v51  ;;  %v2471_v57 = vmul.f32 -1.442695, %v1552_v53  ;;  %v1535_v63 = vadd.f32 %v1534_v59, %v1354_v38 }
 0x2ba   :  { %v2672_v58 = vpop.eup %2671  ;;  %2675 = vrcp.f32 %v3133_v54  ;;  %v3136_v60 = vadd.f32 1.0, %v2670_v56  ;;  %v1650_v23 = vand.u32 2147483647, %v3133_v54  ;;  %v1652_v5 = vand.u32 2147483648, %v3133_v54 }
 0x2bb   :  { %v1627_v52 = vmul.f32 %v2672_v58, %v1618_v43  ;;  %2677 = vpow2.f32 %v2471_v57  ;;  %vm1632_vm0 = vweird.f32 %v2672_v58  ;;  %vm1646_vm5 = vweird.f32 %v3133_v54 }
 0x2bc   :  { %v1589_v62 = vpop.f32.mrf.mxu3  ;;  %2679 = vrcp.f32 %v3136_v60  ;;  %vm1633_vm2 = vmor %vm1631_vm1, %vm1632_vm0  ;;  %v1667_v30 = vand.u32 2147483648, %v3136_v60  ;;  %v1653_v33 = vor.u32 1.1754944e-38, %v1652_v5  ;;  %v1665_v35 = vand.u32 2147483647, %v3136_v60 }
 0x2bd   :  { %v1628_v28 = vsub.f32 1.0, %v1627_v52  ;;  %v1590_v2 = vadd.f32 %v1589_v62, %v1571_v61  ;;  %vm1651_vm8 = vcmp.eq.f32.partialorder %v1650_v23, 8.507059e+37  ;;  %vm1661_vm9 = vweird.f32 %v3136_v60 }
 0x2be   :  { %v1553_v3 = vpop.f32.mrf.mxu1  ;;  %v1572_v17 = vpop.f32.mrf.mxu2  ;;  %v1668_v43 = vor.u32 1.1754944e-38, %v1667_v30  ;;  %vm1666_vm11 = vcmp.eq.f32.partialorder %v1665_v35, 8.507059e+37 }
 0x2bf   :  { %v2674_v44 = vpop.eup %2673  ;;  %v1629_v15 = vmul.f32 %v2672_v58, %v1628_v28  ;;  %v1554_v4 = vadd.f32 %v1553_v3, %v1535_v63  ;;  %v2472_v8 = vmul.f32 -1.442695, %v1590_v2  ;;  %v1573_v25 = vadd.f32 %v1572_v17, %v3129_v9 }
 0x2c0   :  { %v2676_v6 = vpop.eup %2675  ;;  %v3140_v7 = vadd.f32 1.0, %v2674_v44 }
 0x2c1   :  { %v2678_v10 = vpop.eup %2677  ;;  %v1630_v12 = vadd.f32 %v2672_v58, %v1629_v15  ;;  %v1642_v13 = vmul.f32 %v2676_v6, %v3133_v54  ;;  %v2473_v16 = vmul.f32 -1.442695, %v1554_v4  ;;  %vm1647_vm4 = vweird.f32 %v2676_v6 }
 0x2c2   :  { %2681 = vrcp.f32 %v3140_v7  ;;  %v2680_v18 = vpop.eup %2679  ;;  %v3144_v20 = vadd.f32 1.0, %v2678_v10  ;;  %vm1648_vm6 = vmor %vm1646_vm5, %vm1647_vm4  ;;  %v1682_v47 = vand.u32 2147483648, %v3140_v7  ;;  %v1680_v53 = vand.u32 2147483647, %v3140_v7 }
 0x2c3   :  { %v1634_v19 = vsel %vm1633_vm2, %v2672_v58, %v1630_v12  ;;  %v1643_v45 = vsub.f32 1.0, %v1642_v13  ;;  %2683 = vpow2.f32 %v2472_v8  ;;  %v1657_v29 = vmul.f32 %v2680_v18, %v3136_v60 }
 0x2c4   :  { %v1639_v22 = vsel %vm1636_vm3, %v1638_v14, %v1634_v19  ;;  %v1591_v38 = vpop.f32.mrf.mxu3  ;;  %2685 = vrcp.f32 %v3144_v20  ;;  %vm1662_vm7 = vweird.f32 %v2680_v18  ;;  %vm1676_vm13 = vweird.f32 %v3140_v7 }
 0x2c5   :  { %1746 = vst [vmem:[#allocation14] sm:$0xff] %v1639_v22  ;;  %v1644_v24 = vmul.f32 %v2676_v6, %v1643_v45  ;;  %v1658_v26 = vsub.f32 1.0, %v1657_v29  ;;  %2687 = vpow2.f32 %v2473_v16  ;;  %v1592_v31 = vadd.f32 %v1591_v38, %v1573_v25  ;;  %vm1663_vm10 = vmor %vm1661_vm9, %vm1662_vm7 }
 0x2c6   :  { %v1683_v57 = vor.u32 1.1754944e-38, %v1682_v47  ;;  %v1697_v58 = vand.u32 2147483648, %v3144_v20  ;;  %v1695_v52 = vand.u32 2147483647, %v3144_v20  ;;  %vm1681_vm0 = vcmp.eq.f32.partialorder %v1680_v53, 8.507059e+37 }
 0x2c7   :  { %v1645_v27 = vadd.f32 %v2676_v6, %v1644_v24  ;;  %v1659_v34 = vmul.f32 %v2680_v18, %v1658_v26  ;;  %v2474_v37 = vmul.f32 -1.442695, %v1592_v31  ;;  %vm1691_vm1 = vweird.f32 %v3144_v20 }
 0x2c8   :  { %v2682_v32 = vpop.eup %2681  ;;  %v1698_v1 = vor.u32 1.1754944e-38, %v1697_v58  ;;  %vm1696_vm3 = vcmp.eq.f32.partialorder %v1695_v52, 8.507059e+37 }
 0x2c9   :  { %v2684_v36 = vpop.eup %2683  ;;  %v1649_v49 = vsel %vm1648_vm6, %v2676_v6, %v1645_v27  ;;  %v1672_v9 = vmul.f32 %v2682_v32, %v3140_v7  ;;  %v1660_v40 = vadd.f32 %v2680_v18, %v1659_v34  ;;  %2689 = vpow2.f32 %v2474_v37 }
 0x2ca   :  { %v1654_v21 = vsel %vm1651_vm8, %v1653_v33, %v1649_v49  ;;  %v1623_v41 = vadd.f32 1.0, %v2684_v36  ;;  %v2686_v42 = vpop.eup %2685  ;;  %vm1677_vm12 = vweird.f32 %v2682_v32 }
 0x2cb   :  { %1747 = vst [vmem:[#allocation14 + $0x8] sm:$0xff] %v1654_v21  ;;  %v1673_v46 = vsub.f32 1.0, %v1672_v9  ;;  %v2688_v48 = vpop.eup %2687  ;;  %v1664_v11 = vsel %vm1663_vm10, %v2680_v18, %v1660_v40  ;;  %v1687_v39 = vmul.f32 %v2686_v42, %v3144_v20  ;;  %vm1678_vm14 = vmor %vm1676_vm13, %vm1677_vm12  ;;  %vm1692_vm15 = vweird.f32 %v2686_v42 }
 0x2cc   :  { %2691 = vrcp.f32 %v1623_v41  ;;  %v1669_v50 = vsel %vm1666_vm11, %v1668_v43, %v1664_v11  ;;  %v1624_v55 = vadd.f32 1.0, %v2688_v48  ;;  %vm1693_vm2 = vmor %vm1691_vm1, %vm1692_vm15  ;;  %v1710_v6 = vand.u32 2147483647, %v1623_v41 }
 0x2cd   :  { %v1674_v51 = vmul.f32 %v2682_v32, %v1673_v46  ;;  %1748 = vst [vmem:[#allocation14 + $0x10] sm:$0xff] %v1669_v50  ;;  %v1688_v54 = vsub.f32 1.0, %v1687_v39  ;;  %v1712_v7 = vand.u32 2147483648, %v1623_v41  ;;  %vm1706_vm5 = vweird.f32 %v1623_v41 }
 0x2ce   :  { %2693 = vrcp.f32 %v1624_v55  ;;  %vm1711_vm7 = vcmp.eq.f32.partialorder %v1710_v6, 8.507059e+37  ;;  %v1725_v17 = vand.u32 2147483647, %v1624_v55  ;;  %v1727_v18 = vand.u32 2147483648, %v1624_v55 }
 0x2cf   :  { %v1675_v56 = vadd.f32 %v2682_v32, %v1674_v51  ;;  %v1689_v59 = vmul.f32 %v2686_v42, %v1688_v54  ;;  %v2690_v60 = vpop.eup %2689  ;;  %v1713_v16 = vor.u32 1.1754944e-38, %v1712_v7  ;;  %vm1721_vm9 = vweird.f32 %v1624_v55 }
 0x2d0   :  { %v1625_v0 = vadd.f32 1.0, %v2690_v60  ;;  %vm1726_vm11 = vcmp.eq.f32.partialorder %v1725_v17, 8.507059e+37  ;;  %v1728_v29 = vor.u32 1.1754944e-38, %v1727_v18 }
 0x2d1   :  { %v1679_v61 = vsel %vm1678_vm14, %v2682_v32, %v1675_v56  ;;  %v1690_v63 = vadd.f32 %v2686_v42, %v1689_v59 }
 0x2d2   :  { %v2692_v62 = vpop.eup %2691  ;;  %v1684_v28 = vsel %vm1681_vm0, %v1683_v57, %v1679_v61  ;;  %2695 = vrcp.f32 %v1625_v0  ;;  %v1742_v38 = vand.u32 2147483648, %v1625_v0  ;;  %v1740_v26 = vand.u32 2147483647, %v1625_v0 }
 0x2d3   :  { %1749 = vst [vmem:[#allocation14 + $0x18] sm:$0xff] %v1684_v28  ;;  %v1702_v2 = vmul.f32 %v2692_v62, %v1623_v41  ;;  %v1694_v3 = vsel %vm1693_vm2, %v2686_v42, %v1690_v63  ;;  %vm1707_vm4 = vweird.f32 %v2692_v62  ;;  %vm1736_vm13 = vweird.f32 %v1625_v0 }
 0x2d4   :  { %v1699_v44 = vsel %vm1696_vm3, %v1698_v1, %v1694_v3  ;;  %v2694_v4 = vpop.eup %2693  ;;  %vm1708_vm6 = vmor %vm1706_vm5, %vm1707_vm4  ;;  %v1743_v31 = vor.u32 1.1754944e-38, %v1742_v38  ;;  %vm1741_vm15 = vcmp.eq.f32.partialorder %v1740_v26, 8.507059e+37 }
 0x2d5   :  { %v1703_v15 = vsub.f32 1.0, %v1702_v2  ;;  %1750 = vst [vmem:[#allocation14 + $0x20] sm:$0xff] %v1699_v44  ;;  %v1717_v10 = vmul.f32 %v2694_v4, %v1624_v55  ;;  %vm1722_vm8 = vweird.f32 %v2694_v4 }
 0x2d6   :  { %vm1723_vm10 = vmor %vm1721_vm9, %vm1722_vm8 }
 0x2d7   :  { %v1704_v8 = vmul.f32 %v2692_v62, %v1703_v15  ;;  %v1718_v13 = vsub.f32 1.0, %v1717_v10 }
 0x2d8   :  { %v2696_v14 = vpop.eup %2695 }
 0x2d9   :  { %v1705_v12 = vadd.f32 %v2692_v62, %v1704_v8  ;;  %v1719_v45 = vmul.f32 %v2694_v4, %v1718_v13  ;;  %v1732_v20 = vmul.f32 %v2696_v14, %v1625_v0  ;;  %vm1737_vm12 = vweird.f32 %v2696_v14 }
 0x2da   :  { %vm1738_vm14 = vmor %vm1736_vm13, %vm1737_vm12 }
 0x2db   :  { %v1709_v19 = vsel %vm1708_vm6, %v2692_v62, %v1705_v12  ;;  %v1720_v23 = vadd.f32 %v2694_v4, %v1719_v45  ;;  %v1733_v5 = vsub.f32 1.0, %v1732_v20 }
 0x2dc   :  { %v1714_v22 = vsel %vm1711_vm7, %v1713_v16, %v1709_v19 }
 0x2dd   :  { %1751 = vst [vmem:[#allocation14 + $0x28] sm:$0xff] %v1714_v22  ;;  %v1724_v24 = vsel %vm1723_vm10, %v2694_v4, %v1720_v23  ;;  %v1734_v25 = vmul.f32 %v2696_v14, %v1733_v5 }
 0x2de   :  { %v1729_v27 = vsel %vm1726_vm11, %v1728_v29, %v1724_v24 }
 0x2df   :  { %1752 = vst [vmem:[#allocation14 + $0x30] sm:$0xff] %v1729_v27  ;;  %v1735_v30 = vadd.f32 %v2696_v14, %v1734_v25 }
 0x2e1   :  { %v1739_v32 = vsel %vm1738_vm14, %v2696_v14, %v1735_v30 }
 0x2e2   :  { %v1744_v33 = vsel %vm1741_vm15, %v1743_v31, %v1739_v32 }
 0x2e3   :  { %1753 = vst [vmem:[#allocation14 + $0x38] sm:$0xff] %v1744_v33 }
 0x2e4   :  { %1782 = dma.vmem_to_hbm [thread:$0]  %s1775_s9, 1024, %s1777_s11, [#allocation4], %s2950_s17, %s2950_s17, %s2951_s18  }
 0x2e5   :  { %2945 = dma.done.wait [#allocation4], 1024  }
 0x2e6   :  { %2946 = vsyncadd [#allocation4], 4294966272 }
 0x2e7   :  { %2947 = dma.done.wait [#allocation16], 2048  }
 0x2e8   :  { %2948 = vsyncadd [#allocation16], 4294965248 }
 0x2e9   :  { %1821 = vsyncpa [#allocation3], 1 }
 0x2ea   :  { %1822 = vsyncpa [#allocation6], 1 }
 0x2eb   :  { %1823 = vsyncpa [#allocation9], 1 }
 0x2ec   :  { %1824 = vsyncpa [#allocation12], 1 }
 0x2ed   :  { %1825 = vsyncpa [#allocation4], 1 }
 0x2ee   :  { %1826 = vsyncpa [#allocation16], 1 }

</bundles_post_ra>
